<compile_context>
chip_gen: v7x
topology: tpu7x:2x2x1
jax: 0.10.0
libtpu: 0.0.40
codegen_flags: <defaults>
</compile_context>

<pallas_src>
import math

import numpy as np

import jax
import jax.numpy as jnp
from jax.experimental import pallas as pl
from jax.experimental.pallas import tpu as pltpu


# ---------------------------------------------------------------------------
# Helpers
# ---------------------------------------------------------------------------
def _round_up(x, m):
    return ((x + m - 1) // m) * m


def _pick_tile(n, target):
    """Batch tile (lanes): multiple of 128, aiming for >= 4 grid steps."""
    quarter = _round_up(max(1, pl.cdiv(n, 4)), 128)
    return max(128, min(_round_up(target, 128), quarter))


# ---------------------------------------------------------------------------
# Wrapper: fused normalization + Fourier embedding + 3-layer MLP.
# ---------------------------------------------------------------------------
def net_sequential_f_forward(inputs, lb, ub, scales_sd, params, *, tb=2048):
    """
    inputs    : tuple of (N, 1) arrays, e.g. (x, t)
    lb, ub    : (1, D) (or (D,)) lower/upper bounds for normalization
    scales_sd : (S, D) learnable frequency scales (PyTorch layout)
    params    : list of 3 tuples (W(in,out), b(1,out))
    tb        : target batch columns per grid step (rounded to 128 lanes)
    """
    cols = [jnp.asarray(i, jnp.float32).reshape(1, -1) for i in inputs]
    D = len(cols)
    N = cols[0].shape[1]
    S = scales_sd.shape[0]
    assert scales_sd.shape == (S, D)
    DS = D * S
    blk = 2 * S + 1
    n_rep = DS + D                       # replicated sin/cos rows + raw rows

    (w1, b1), (w2, b2), (w3, b3) = params
    n_in, h1 = w1.shape
    _, h2 = w2.shape
    _, n_out = w3.shape
    assert n_in == D * blk

    # ---- trace-time constant folding ----------------------------------
    # norm = x*a + c ;  proj = norm * 2*pi*scale  ==>  proj = x*(a*w) + (c*w)
    lbv = jnp.asarray(lb, jnp.float32).reshape(D)
    ubv = jnp.asarray(ub, jnp.float32).reshape(D)
    a_vec = 2.0 / (ubv - lbv)                              # (D,)
    c_vec = -2.0 * lbv / (ubv - lbv) - 1.0                 # (D,)
    # freq[d*S + j] = 2*pi*scales[j, d]
    freq = (2.0 * math.pi * scales_sd.astype(jnp.float32).T).reshape(DS)
    A = jnp.concatenate([jnp.repeat(a_vec, S) * freq, a_vec]).reshape(n_rep, 1)
    C = jnp.concatenate([jnp.repeat(c_vec, S) * freq, c_vec]).reshape(n_rep, 1)

    # feature-major (transposed) input with the sin/cos rows pre-replicated:
    #   x_emb[d*S + j, n] = x[n, d]   (rows 0 .. DS-1, shared by sin and cos)
    #   x_emb[DS + d, n]  = x[n, d]   (raw rows for the "norm" features)
    x_t = jnp.concatenate(cols, axis=0)                    # (D, N)
    x_emb = jnp.concatenate([jnp.repeat(x_t, S, axis=0), x_t], axis=0)

    # Row-permute + transpose W1 so a single K=n_in GEMM matches the
    # [sin group | cos group | norm group] embedding slab order.
    idx_sin = np.concatenate([d * blk + np.arange(S) for d in range(D)])
    idx_cos = idx_sin + S
    idx_norm = np.array([d * blk + 2 * S for d in range(D)])
    perm = np.concatenate([idx_sin, idx_cos, idx_norm])
    w1t = jnp.asarray(w1, jnp.float32)[perm, :].T          # (h1, n_in)
    b1t = jnp.asarray(b1, jnp.float32).reshape(h1, 1)
    w2t = jnp.asarray(w2, jnp.float32).T                   # (h2, h1)
    b2t = jnp.asarray(b2, jnp.float32).reshape(h2, 1)
    w3t = jnp.asarray(w3, jnp.float32).T                   # (n_out, h2)
    b3t = jnp.asarray(b3, jnp.float32).reshape(n_out, 1)

    TB = _pick_tile(N, tb)
    grid = (pl.cdiv(N, TB),)            # ragged last tile handled by Pallas

    # ---- kernel (closes over the small static ints DS, D) -------------
    def kernel(x_ref, a_ref, c_ref, w1_ref, b1_ref, w2_ref, b2_ref,
               w3_ref, b3_ref, out_ref, emb_ref):
        # normalization + 2*pi*scale folded into one per-sublane FMA (VPU)
        z = x_ref[...] * a_ref[...] + c_ref[...]           # (DS+D, TB)
        proj = z[0:DS, :]                                  # (DS, TB)
        norm = z[DS:, :]                                   # (D,  TB)

        # assemble the [sin; cos; norm] slab in VMEM scratch (lane-dense,
        # sublane-contiguous writes) -> feeds ONE K=n_in GEMM.
        emb_ref[0:DS, :] = jnp.sin(proj)                   # EUP, full vregs
        emb_ref[DS:2 * DS, :] = jnp.cos(proj)
        emb_ref[2 * DS:2 * DS + D, :] = norm

        h = jnp.tanh(jnp.dot(w1_ref[...], emb_ref[...],
                             preferred_element_type=jnp.float32) + b1_ref[...])
        h = jnp.tanh(jnp.dot(w2_ref[...], h,
                             preferred_element_type=jnp.float32) + b2_ref[...])
        out = jnp.dot(w3_ref[...], h,
                      preferred_element_type=jnp.float32) + b3_ref[...]
        out_ref[...] = out.astype(out_ref.dtype)           # (n_out, TB) lane-dense

    const = lambda shape: pl.BlockSpec(shape, lambda b: (0,) * len(shape))

    cost = pl.CostEstimate(
        flops=int(2 * N * (n_in * h1 + h1 * h2 + h2 * n_out + n_rep)),
        transcendentals=int(N * (2 * DS + h1 + h2)),
        bytes_accessed=int(4 * (N * (n_rep + n_out) + n_in * h1 + h1 * h2
                                + h2 * n_out + h1 + h2 + n_out + 2 * n_rep)),
    )

    out_t = pl.pallas_call(
        kernel,
        out_shape=jax.ShapeDtypeStruct((n_out, N), jnp.float32),
        grid_spec=pltpu.PrefetchScalarGridSpec(
            num_scalar_prefetch=0,
            grid=grid,
            in_specs=[
                pl.BlockSpec((n_rep, TB), lambda b: (0, b)),  # x tile (feature-major)
                const((n_rep, 1)),                            # folded FMA scale
                const((n_rep, 1)),                            # folded FMA offset
                const((h1, n_in)),                            # W1^T (row-permuted)
                const((h1, 1)),                               # b1
                const((h2, h1)),                              # W2^T
                const((h2, 1)),                               # b2
                const((n_out, h2)),                           # W3^T
                const((n_out, 1)),                            # b3
            ],
            out_specs=pl.BlockSpec((n_out, TB), lambda b: (0, b)),
            scratch_shapes=[pltpu.VMEM((n_in, TB), jnp.float32)],
        ),
        compiler_params=pltpu.CompilerParams(
            dimension_semantics=("parallel",)),
        cost_estimate=cost,
    )(x_emb, A, C, w1t, b1t, w2t, b2t, w3t, b3t)

    return out_t.T                                           # (N, n_out)


# ---------------------------------------------------------------------------
# Pure-JAX reference (mirrors the PyTorch forward exactly).
# ---------------------------------------------------------------------------
def reference_forward(inputs, lb, ub, scales_sd, params):
    x = jnp.concatenate(inputs, axis=1)
    lb = jnp.asarray(lb, jnp.float32).reshape(1, -1)
    ub = jnp.asarray(ub, jnp.float32).reshape(1, -1)
    norm = 2.0 * (x - lb) / (ub - lb) - 1.0
    D = x.shape[1]
    feats = []
    for i in range(D):
        col = norm[:, i:i + 1]
        ms = col * (2.0 * math.pi * scales_sd[:, i][None, :])
        feats.append(jnp.concatenate([jnp.sin(ms), jnp.cos(ms), col], axis=1))
    h = jnp.concatenate(feats, axis=1)
    (w1, b1), (w2, b2), (w3, b3) = params
    h = jnp.tanh(h @ w1 + b1)
    h = jnp.tanh(h @ w2 + b2)
    return h @ w3 + b3


if __name__ == "__main__":
    key = jax.random.PRNGKey(0)

    # Problem setup: 2 input dims (x, t), 4 Fourier scales, hidden width 32.
    N = 2000                      # exercises tiling + ragged last block
    D = 2
    scale_values = jnp.array([1.0, 2.0, 4.0, 8.0], dtype=jnp.float32)   # S = 4
    S = scale_values.shape[0]
    n_in = D * (2 * S + 1)        # = 18, nodes[0]
    nodes = [n_in, 32, 32, 1]

    lb = jnp.array([[-1.0, 0.0]], dtype=jnp.float32)   # (1, D)
    ub = jnp.array([[1.0, 1.0]], dtype=jnp.float32)    # (1, D)

    # PyTorch layout: scales (S, D) = np.array(scales)[:, None].repeat(D, 1)
    scales_sd = jnp.tile(scale_values[:, None], (1, D)).astype(jnp.float32)

    # Deterministic nn.Linear-style init: U(-1/sqrt(fan_in), 1/sqrt(fan_in)).
    params = []
    for i in range(len(nodes) - 1):
        fan_in, fan_out = nodes[i], nodes[i + 1]
        key, kw, kb = jax.random.split(key, 3)
        bound = 1.0 / math.sqrt(fan_in)
        w = jax.random.uniform(kw, (fan_in, fan_out), jnp.float32, -bound, bound)
        b = jax.random.uniform(kb, (1, fan_out), jnp.float32, -bound, bound)
        params.append((w, b))

    # Example inputs (x, t), each (N, 1).
    key, kx, kt = jax.random.split(key, 3)
    x_in = jax.random.uniform(kx, (N, 1), jnp.float32, -1.0, 1.0)
    t_in = jax.random.uniform(kt, (N, 1), jnp.float32, 0.0, 1.0)

    fwd = jax.jit(lambda xa, ta: net_sequential_f_forward(
        (xa, ta), lb, ub, scales_sd, params))
    out = jax.block_until_ready(fwd(x_in, t_in))

    ref = reference_forward((x_in, t_in), lb, ub, scales_sd, params)
    assert out.shape == (N, 1)
    max_err = float(jnp.max(jnp.abs(out - ref)))
    assert jnp.allclose(out, ref, atol=5e-4, rtol=5e-4), \
        f"mismatch vs reference (max abs err {max_err})"

    print("KERNEL_OK")
</pallas_src>

<mosaic_0001>
module attributes {stable_mosaic.version = 11 : i64} {
  func.func @kernel(%arg0: i32, %arg1: memref<10x512xf32, #tpu.memory_space<vmem>>, %arg2: memref<10x1xf32, #tpu.memory_space<vmem>>, %arg3: memref<10x1xf32, #tpu.memory_space<vmem>>, %arg4: memref<32x18xf32, #tpu.memory_space<vmem>>, %arg5: memref<32x1xf32, #tpu.memory_space<vmem>>, %arg6: memref<32x32xf32, #tpu.memory_space<vmem>>, %arg7: memref<32x1xf32, #tpu.memory_space<vmem>>, %arg8: memref<1x32xf32, #tpu.memory_space<vmem>>, %arg9: memref<1x1xf32, #tpu.memory_space<vmem>>, %arg10: memref<1x512xf32, #tpu.memory_space<vmem>>, %arg11: memref<18x512xf32, #tpu.memory_space<vmem>>) attributes {dimension_semantics = [#tpu.dimension_semantics<parallel>], iteration_bounds = array<i64: 4>, scalar_prefetch = 0 : i64, scratch_operands = 1 : i64, tpu.core_type = #tpu.core_type<tc>, window_params = [{transform_indices = @transform_0, window_bounds = array<i64: 10, 512>}, {pipeline_mode = #tpu.pipeline_mode<synchronous>, transform_indices = @transform_1, window_bounds = array<i64: 10, 1>}, {pipeline_mode = #tpu.pipeline_mode<synchronous>, transform_indices = @transform_2, window_bounds = array<i64: 10, 1>}, {pipeline_mode = #tpu.pipeline_mode<synchronous>, transform_indices = @transform_3, window_bounds = array<i64: 32, 18>}, {pipeline_mode = #tpu.pipeline_mode<synchronous>, transform_indices = @transform_4, window_bounds = array<i64: 32, 1>}, {pipeline_mode = #tpu.pipeline_mode<synchronous>, transform_indices = @transform_5, window_bounds = array<i64: 32, 32>}, {pipeline_mode = #tpu.pipeline_mode<synchronous>, transform_indices = @transform_6, window_bounds = array<i64: 32, 1>}, {pipeline_mode = #tpu.pipeline_mode<synchronous>, transform_indices = @transform_7, window_bounds = array<i64: 1, 32>}, {pipeline_mode = #tpu.pipeline_mode<synchronous>, transform_indices = @transform_8, window_bounds = array<i64: 1, 1>}, {transform_indices = @transform_9, window_bounds = array<i64: 1, 512>}]} {
    %c0 = arith.constant 0 : index
    %c0_0 = arith.constant 0 : index
    %0 = vector.load %arg1[%c0, %c0_0] : memref<10x512xf32, #tpu.memory_space<vmem>>, vector<10x512xf32>
    %c0_1 = arith.constant 0 : index
    %c0_2 = arith.constant 0 : index
    %1 = vector.load %arg2[%c0_1, %c0_2] : memref<10x1xf32, #tpu.memory_space<vmem>>, vector<10x1xf32>
    %2 = vector.broadcast %1 : vector<10x1xf32> to vector<10x512xf32>
    %3 = arith.mulf %0, %2 : vector<10x512xf32>
    %c0_3 = arith.constant 0 : index
    %c0_4 = arith.constant 0 : index
    %4 = vector.load %arg3[%c0_3, %c0_4] : memref<10x1xf32, #tpu.memory_space<vmem>>, vector<10x1xf32>
    %5 = vector.broadcast %4 : vector<10x1xf32> to vector<10x512xf32>
    %6 = arith.addf %3, %5 : vector<10x512xf32>
    %7 = vector.extract_strided_slice %6 {offsets = [0, 0], sizes = [8, 512], strides = [1, 1]} : vector<10x512xf32> to vector<8x512xf32>
    %8 = vector.extract_strided_slice %6 {offsets = [8, 0], sizes = [2, 512], strides = [1, 1]} : vector<10x512xf32> to vector<2x512xf32>
    %9 = math.sin %7 : vector<8x512xf32>
    %c0_5 = arith.constant 0 : index
    %c0_6 = arith.constant 0 : index
    %10 = vector.load %arg11[%c0_5, %c0_6] : memref<18x512xf32, #tpu.memory_space<vmem>>, vector<8x512xf32>
    tpu.vector_store %arg11[%c0_5, %c0_6], %9 {strides = array<i32>} : memref<18x512xf32, #tpu.memory_space<vmem>>, vector<8x512xf32>,
    %11 = math.cos %7 : vector<8x512xf32>
    %c8 = arith.constant 8 : index
    %c0_7 = arith.constant 0 : index
    %12 = vector.load %arg11[%c8, %c0_7] : memref<18x512xf32, #tpu.memory_space<vmem>>, vector<8x512xf32>
    tpu.vector_store %arg11[%c8, %c0_7], %11 {strides = array<i32>} : memref<18x512xf32, #tpu.memory_space<vmem>>, vector<8x512xf32>,
    %c16 = arith.constant 16 : index
    %c0_8 = arith.constant 0 : index
    %13 = vector.load %arg11[%c16, %c0_8] : memref<18x512xf32, #tpu.memory_space<vmem>>, vector<2x512xf32>
    tpu.vector_store %arg11[%c16, %c0_8], %8 {strides = array<i32>} : memref<18x512xf32, #tpu.memory_space<vmem>>, vector<2x512xf32>,
    %c0_9 = arith.constant 0 : index
    %c0_10 = arith.constant 0 : index
    %14 = vector.load %arg4[%c0_9, %c0_10] : memref<32x18xf32, #tpu.memory_space<vmem>>, vector<32x18xf32>
    %c0_11 = arith.constant 0 : index
    %c0_12 = arith.constant 0 : index
    %15 = vector.load %arg11[%c0_11, %c0_12] : memref<18x512xf32, #tpu.memory_space<vmem>>, vector<18x512xf32>
    %cst = arith.constant dense<0.000000e+00> : vector<32x512xf32>
    %16 = tpu.matmul %14, %15, %cst {dimension_numbers = #tpu.dot_dimension_numbers<[1], [0], [0], [1], [0, 0, 1, 1], [], []>} : vector<32x18xf32>, vector<18x512xf32>, vector<32x512xf32> -> vector<32x512xf32>
    %c0_13 = arith.constant 0 : index
    %c0_14 = arith.constant 0 : index
    %17 = vector.load %arg5[%c0_13, %c0_14] : memref<32x1xf32, #tpu.memory_space<vmem>>, vector<32x1xf32>
    %18 = vector.broadcast %17 : vector<32x1xf32> to vector<32x512xf32>
    %19 = arith.addf %16, %18 : vector<32x512xf32>
    %20 = math.tanh %19 : vector<32x512xf32>
    %c0_15 = arith.constant 0 : index
    %c0_16 = arith.constant 0 : index
    %21 = vector.load %arg6[%c0_15, %c0_16] : memref<32x32xf32, #tpu.memory_space<vmem>>, vector<32x32xf32>
    %cst_17 = arith.constant dense<0.000000e+00> : vector<32x512xf32>
    %22 = tpu.matmul %21, %20, %cst_17 {dimension_numbers = #tpu.dot_dimension_numbers<[1], [0], [0], [1], [0, 0, 1, 1], [], []>} : vector<32x32xf32>, vector<32x512xf32>, vector<32x512xf32> -> vector<32x512xf32>
    %c0_18 = arith.constant 0 : index
    %c0_19 = arith.constant 0 : index
    %23 = vector.load %arg7[%c0_18, %c0_19] : memref<32x1xf32, #tpu.memory_space<vmem>>, vector<32x1xf32>
    %24 = vector.broadcast %23 : vector<32x1xf32> to vector<32x512xf32>
    %25 = arith.addf %22, %24 : vector<32x512xf32>
    %26 = math.tanh %25 : vector<32x512xf32>
    %c0_20 = arith.constant 0 : index
    %c0_21 = arith.constant 0 : index
    %27 = vector.load %arg8[%c0_20, %c0_21] : memref<1x32xf32, #tpu.memory_space<vmem>>, vector<1x32xf32>
    %cst_22 = arith.constant dense<0.000000e+00> : vector<1x512xf32>
    %28 = tpu.matmul %27, %26, %cst_22 {dimension_numbers = #tpu.dot_dimension_numbers<[1], [0], [0], [1], [0, 0, 1, 1], [], []>} : vector<1x32xf32>, vector<32x512xf32>, vector<1x512xf32> -> vector<1x512xf32>
    %c0_23 = arith.constant 0 : index
    %c0_24 = arith.constant 0 : index
    %29 = vector.load %arg9[%c0_23, %c0_24] : memref<1x1xf32, #tpu.memory_space<vmem>>, vector<1x1xf32>
    %30 = vector.broadcast %29 : vector<1x1xf32> to vector<1x512xf32>
    %31 = arith.addf %28, %30 : vector<1x512xf32>
    %c0_25 = arith.constant 0 : index
    %c0_26 = arith.constant 0 : index
    %32 = vector.load %arg10[%c0_25, %c0_26] : memref<1x512xf32, #tpu.memory_space<vmem>>, vector<1x512xf32>
    tpu.vector_store %arg10[%c0_25, %c0_26], %31 {strides = array<i32>} : memref<1x512xf32, #tpu.memory_space<vmem>>, vector<1x512xf32>,
    return
  }
  func.func @transform_0(%arg0: i32) -> (i32, i32) {
    %c0_i32 = arith.constant 0 : i32
    %c0_i32_0 = arith.constant 0 : i32
    return %c0_i32, %arg0 : i32, i32
  }
  func.func @transform_1(%arg0: i32) -> (i32, i32) {
    %c0_i32 = arith.constant 0 : i32
    %c0_i32_0 = arith.constant 0 : i32
    %c0_i32_1 = arith.constant 0 : i32
    return %c0_i32, %c0_i32_0 : i32, i32
  }
  func.func @transform_2(%arg0: i32) -> (i32, i32) {
    %c0_i32 = arith.constant 0 : i32
    %c0_i32_0 = arith.constant 0 : i32
    %c0_i32_1 = arith.constant 0 : i32
    return %c0_i32, %c0_i32_0 : i32, i32
  }
  func.func @transform_3(%arg0: i32) -> (i32, i32) {
    %c0_i32 = arith.constant 0 : i32
    %c0_i32_0 = arith.constant 0 : i32
    %c0_i32_1 = arith.constant 0 : i32
    return %c0_i32, %c0_i32_0 : i32, i32
  }
  func.func @transform_4(%arg0: i32) -> (i32, i32) {
    %c0_i32 = arith.constant 0 : i32
    %c0_i32_0 = arith.constant 0 : i32
    %c0_i32_1 = arith.constant 0 : i32
    return %c0_i32, %c0_i32_0 : i32, i32
  }
  func.func @transform_5(%arg0: i32) -> (i32, i32) {
    %c0_i32 = arith.constant 0 : i32
    %c0_i32_0 = arith.constant 0 : i32
    %c0_i32_1 = arith.constant 0 : i32
    return %c0_i32, %c0_i32_0 : i32, i32
  }
  func.func @transform_6(%arg0: i32) -> (i32, i32) {
    %c0_i32 = arith.constant 0 : i32
    %c0_i32_0 = arith.constant 0 : i32
    %c0_i32_1 = arith.constant 0 : i32
    return %c0_i32, %c0_i32_0 : i32, i32
  }
  func.func @transform_7(%arg0: i32) -> (i32, i32) {
    %c0_i32 = arith.constant 0 : i32
    %c0_i32_0 = arith.constant 0 : i32
    %c0_i32_1 = arith.constant 0 : i32
    return %c0_i32, %c0_i32_0 : i32, i32
  }
  func.func @transform_8(%arg0: i32) -> (i32, i32) {
    %c0_i32 = arith.constant 0 : i32
    %c0_i32_0 = arith.constant 0 : i32
    %c0_i32_1 = arith.constant 0 : i32
    return %c0_i32, %c0_i32_0 : i32, i32
  }
  func.func @transform_9(%arg0: i32) -> (i32, i32) {
    %c0_i32 = arith.constant 0 : i32
    %c0_i32_0 = arith.constant 0 : i32
    return %c0_i32, %arg0 : i32, i32
  }
}

</mosaic_0001>

<bundles_post_ra>
// kernel: _lambda_.1
= control target key start
LH: loop header
LB: loop body
LE: loop exit
PB: predicated region body
PF: predicated region fallthrough
CT: control target
= control target key end

     0   :  { %s2969_s0 = inlined_call_operand.vmem [shape: f32[10,2000], index: 0, kind: input, shape index: {}]   ;;  %s2970_s1 = inlined_call_operand.vmem [shape: f32[10,1], index: 1, kind: input, shape index: {}]   ;;  %s2971_s2 = inlined_call_operand.vmem [shape: f32[10,1], index: 2, kind: input, shape index: {}]   ;;  %s2972_s3 = inlined_call_operand.vmem [shape: f32[32,18], index: 3, kind: input, shape index: {}]   ;;  %s2973_s4 = inlined_call_operand.vmem [shape: f32[32,1], index: 4, kind: input, shape index: {}]   ;;  %s2974_s5 = inlined_call_operand.vmem [shape: f32[32,32], index: 5, kind: input, shape index: {}]   ;;  %s2975_s6 = inlined_call_operand.vmem [shape: f32[32,1], index: 6, kind: input, shape index: {}]   ;;  %s2976_s7 = inlined_call_operand.vmem [shape: f32[1,32], index: 7, kind: input, shape index: {}]   ;;  %s2977_s8 = inlined_call_operand.<no memory space> [shape: f32[1,1], index: 8, kind: input, shape index: {}]   ;;  %s2978_s9 = inlined_call_operand.hbm [shape: f32[1,2000], index: 9, kind: output, shape index: {}]  }
   0x1   :  { %v14_v0 = vstv %s2977_s8 }
   0x2   :  { %15 = vst [vmem:[#allocation3] sm:$0x1] %v14_v0 }
   0x3   :  { %16 = vsyncpa [#allocation6], 0 }
   0x4   :  { %18 = vsyncpa [#allocation6 + $0x1], 0  ;;  %s2405_s11 = smov 0   ;;  %s2407_s12 = smov 0  }
   0x5   :  { %s2409_s13 = smov 0   ;;  %s2411_s14 = smov 0  }
   0x6 LB: > { %s2021_s8 = sadd.s32 4294967295, %s2340_s14   ;;  %s2022_s15 = sadd.s32 4294967294, %s2340_s14   ;;  %s2340_s14 = sphi %s2411_s14, %s2988_s14   ;;  %s2336_s13 = sphi %s2409_s13, %s2987_s13   ;;  %s2332_s12 = sphi %s2407_s12, %s2986_s12   ;;  %s2328_s11 = sphi %s2405_s11, %s2985_s11  }
   0x7   : > { %s2428_s16 = sadd.s32 1, %s2340_s14   ;;  %s31_s17 = sadd.s32 1, %s2336_s13 }
   0x8   : > { %s28_s18 = ssub.s32 %s2340_s14, %s2428_s16  ;;  %p38_p0 = scmp.ne.s32.totalorder %s2336_s13, %s2332_s12 }
   0x9   : > { %p29_p1 = scmp.eq.s32.totalorder %s28_s18, 0  ;;  %p39_p2 = scmp.eq.s32.totalorder %s2340_s14, 0 }
   0xa   : > { %p236_p3 = scmp.eq.s32.totalorder %s2021_s8, 3  ;;  %p241_p4 = scmp.ne.s32.totalorder %s2332_s12, %s2328_s11 }
   0xb   : > { %s2441_s19 = scalar_select %p29_p1, %s2336_s13, %s31_s17  }
   0xc   : > { %p40_p5 = por %p39_p2, %p38_p0  ;;  %p2443_p6 = por %p236_p3, %p38_p0 }
   0xd   : > { %p242_p7 = scmp.eq.s32.totalorder %s2022_s15, 3  ;;  %p2024_p9 = scmp.ge.s32.totalorder %s2340_s14, 4 }
   0xf   : > { %p2447_p8 = por %p242_p7, %p241_p4  ;;  %282 = sbr.rel (%p2024_p9) target bundleno = 30 (0x1e), region = 48 }
  0x16   : > { %285 = sbr.rel (!%p40_p5) target bundleno = 30 (0x1e), region = 52  ;;  %s287_s22 = sand.u32 (%p40_p5), 1, %s2336_s13  }
  0x17   : > { %s2090_s23 = sshll.u32 (%p40_p5), %s2340_s14, 5  ;;  %s2025_s24 = sshll.u32 (%p40_p5), %s287_s22, 6 }
  0x18   : > { %s292_s27 = scalar_lea.vmem (%p40_p5), %s2969_s0, %s2090_s23  ;;  %s289_s28 = scalar_lea.vmem (%p40_p5), [#allocation4], %s2025_s24 }
  0x19   : > { %v305_v1 = vld [vmem:[%s292_s27] sm:$0xff] (%p40_p5)  ;;  %v307_v2 = vld [vmem:[%s292_s27 + $0x8] sm:$0xff] (%p40_p5)  ;;  %v309_v3 = vld [vmem:[%s292_s27 + $0x10] sm:$0xff] (%p40_p5) }
  0x1a   : > { %306 = vst [vmem:[%s289_s28] sm:$0xff] (%p40_p5), %v305_v1  ;;  %308 = vst [vmem:[%s289_s28 + $0x8] sm:$0xff] (%p40_p5), %v307_v2  ;;  %v311_v4 = vld [vmem:[%s292_s27 + $0x18] sm:$0xff] (%p40_p5)  ;;  %v313_v5 = vld [vmem:[%s292_s27 + $0x80] sm:$0xff] (%p40_p5) }
  0x1b   : > { %310 = vst [vmem:[%s289_s28 + $0x10] sm:$0xff] (%p40_p5), %v309_v3  ;;  %v315_v6 = vld [vmem:[%s292_s27 + $0x88] sm:$0xff] (%p40_p5)  ;;  %312 = vst [vmem:[%s289_s28 + $0x18] sm:$0xff] (%p40_p5), %v311_v4  ;;  %v317_v7 = vld [vmem:[%s292_s27 + $0x90] sm:$0xff] (%p40_p5) }
  0x1c   : > { %314 = vst [vmem:[%s289_s28 + $0x20] sm:$0xff] (%p40_p5), %v313_v5  ;;  %316 = vst [vmem:[%s289_s28 + $0x28] sm:$0xff] (%p40_p5), %v315_v6  ;;  %v319_v8 = vld [vmem:[%s292_s27 + $0x98] sm:$0xff] (%p40_p5) }
  0x1d   : > { %318 = vst [vmem:[%s289_s28 + $0x30] sm:$0xff] %v317_v7  ;;  %320 = vst [vmem:[%s289_s28 + $0x38] sm:$0xff] %v319_v8 }
  0x1e PF: > { %p2028_p10 = scmp.ge.s32.totalorder %s2340_s14, 1  ;;  %p325_p11 = scmp.lt.s32.totalorder %s2340_s14, 5 }
  0x20   : > { %p326_p12 = pnand %p2028_p10, %p325_p11 }
  0x21   : > { %v377_v9 = vld [vmem:[%s2970_s1] sm:$0xff] (!%p326_p12)  ;;  %v2342_v10 = vmov (!%p326_p12), 0   ;;  %v378_v11 = vld [vmem:[%s2970_s1 + $0x8] sm:$0x3] (!%p326_p12)  ;;  %v1275_v16 = vld [vmem:[%s2973_s4 + $0x10] sm:$0xff] (!%p326_p12)  ;;  %s2496_s27 = sand.u32 (!%p326_p12), 1, %s2332_s12  }
  0x22   : > { %329 = sbr.rel (%p326_p12) target bundleno = 1038 (0x40e), region = 75  ;;  %2196 = vset.pattern.permute.xlu0 (!%p326_p12), %v2342_v10  ;;  %2197 = vset.pattern.permute.xlu1 (!%p326_p12), %v2342_v10  ;;  %v397_v12 = vld [vmem:[%s2971_s2] sm:$0xff] (!%p326_p12)  ;;  %v398_v13 = vld [vmem:[%s2971_s2 + $0x8] sm:$0x3] (!%p326_p12)  ;;  %v1276_v17 = vld [vmem:[%s2973_s4 + $0x18] sm:$0xff] (!%p326_p12)  ;;  %s2029_s28 = sshll.u32 (!%p326_p12), %s2496_s27, 6 }
  0x23   : > { %381 = vperm.xlu0 (!%p326_p12), %2196, %v377_v9   ;;  %386 = vperm.xlu1 (!%p326_p12), %2197, %v378_v11   ;;  %v1273_v14 = vld [vmem:[%s2973_s4] sm:$0xff] (!%p326_p12)  ;;  %v1274_v15 = vld [vmem:[%s2973_s4 + $0x8] sm:$0xff] (!%p326_p12)  ;;  %v1523_v20 = vld [vmem:[%s2975_s6 + $0x10] sm:$0xff] (!%p326_p12)  ;;  %s2499_s29 = scalar_lea.vmem (!%p326_p12), [#allocation4], %s2029_s28  ;;  %v2343_v1 = vmov (!%p326_p12), 683565275  }
  0x24   : > { %v1521_v18 = vld [vmem:[%s2975_s6] sm:$0xff] (!%p326_p12)  ;;  %v1522_v19 = vld [vmem:[%s2975_s6 + $0x8] sm:$0xff] (!%p326_p12)  ;;  %v1524_v21 = vld [vmem:[%s2975_s6 + $0x18] sm:$0xff] (!%p326_p12)  ;;  %v2344_v5 = vmov (!%p326_p12), 2475754826   ;;  %s2030_s23 = sshll.u32 (!%p326_p12), %s2496_s27, 2 }
  0x25   : > { %v1753_v22 = vld [vmem:[#allocation3] sm:$0x1] (!%p326_p12)  ;;  %v369_v24 = vld [vmem:[%s2499_s29] sm:$0xff] (!%p326_p12)  ;;  %v370_v25 = vld [vmem:[%s2499_s29 + $0x8] sm:$0xff] (!%p326_p12)  ;;  %v2345_v7 = vmov (!%p326_p12), 2131351028  }
  0x26   : > { %v371_v26 = vld [vmem:[%s2499_s29 + $0x10] sm:$0xff] (!%p326_p12)  ;;  %v372_v36 = vld [vmem:[%s2499_s29 + $0x18] sm:$0xff] (!%p326_p12)  ;;  %v2346_v9 = vmov (!%p326_p12), 2102212464   ;;  %v2347_v11 = vmov (!%p326_p12), 920167782  }
  0x27   : > { %401 = vperm.xlu0 (!%p326_p12), %2196, %v397_v12   ;;  %406 = vperm.xlu1 (!%p326_p12), %2197, %v398_v13   ;;  %s2091_s24 = sshll.u32 (!%p326_p12), %s2021_s8, 6  ;;  %s366_s25 = scalar_lea.vmem (!%p326_p12), [#allocation5], %s2030_s23 }
  0x28   : > { %s1957_s26 = sshll.u32 (!%p326_p12), %s366_s25, 4  ;;  %s2926_s30 = scalar_lea.hbm (!%p326_p12), %s2978_s9, %s2091_s24  ;;  %s2928_s26 = int_to_ptr.vmem [resolvable:$true] %s1957_s26 }
  0x29   : > { %s1943_s10 = scalar_lea.sflag [#allocation6], %s2496_s27  ;;  %s2278_s15 = scalar_lea.vmem %s2928_s26, 64 }
  0x2a   : > { %p2279_p13 = scmp.ne.s32.totalorder %s2928_s26, %s2278_s15  ;;  %s2351_s8 = smov [#allocation5]  }
  0x2b   : > { %1279 = vperm.xlu0 %2196, %v1273_v14   ;;  %1284 = vperm.xlu1 %2197, %v1274_v15   ;;  %s2282_s17 = sshll.u32 %s2351_s8, 4  ;;  %s2283_s17 = int_to_ptr.vmem [resolvable:$false] %s2282_s17 }
  0x2c   : > { %p2280_p0 = pnand %p2279_p13, %p2443_p6  ;;  %s2284_s18 = scalar_lea.vmem %s2283_s17, 128 }
  0x2d   : > { %p2285_p2 = scmp.lt.s32.totalorder %s2928_s26, %s2283_s17  ;;  %p2286_p3 = scmp.lt.s32.totalorder %s2284_s18, %s2278_s15 }
  0x2e   : > { %p2281_p1 = pneg %p2280_p0 }
  0x2f   : > { %1289 = vperm.xlu0 %2196, %v1275_v16   ;;  %1294 = vperm.xlu1 %2197, %v1276_v17   ;;  %p2287_p4 = por %p2286_p3, %p2285_p2 }
  0x31   : > { %p2288_p5 = pnand %p2287_p4, %p2281_p1 }
  0x33   : > { %1527 = vperm.xlu0 %2196, %v1521_v18   ;;  %1532 = vperm.xlu1 %2197, %v1522_v19   ;;  %v2348_v18 = vmov 1326507024  }
  0x37   : > { %1537 = vperm.xlu0 %2196, %v1523_v20   ;;  %1542 = vperm.xlu1 %2197, %v1524_v21  }
  0x3b   : > { %1756 = vperm.xlu0 %2196, %v1753_v22  }
  0xa2   : > { %v382_v23 = vpop.permute.xlu0 %381 }
  0xa3   : > { %v389_v27 = vmul.f32 %v382_v23, %v369_v24  ;;  %v390_v28 = vmul.f32 %v382_v23, %v370_v25  ;;  %v391_v29 = vmul.f32 %v382_v23, %v371_v26  ;;  %v392_v44 = vmul.f32 %v382_v23, %v372_v36 }
  0xa6   : > { %v402_v30 = vpop.permute.xlu0 %401 }
  0xa7   : > { %v2504_v31 = vadd.f32 %v402_v30, %v389_v27  ;;  %v2506_v32 = vadd.f32 %v402_v30, %v390_v28  ;;  %v2508_v33 = vadd.f32 %v402_v30, %v391_v29  ;;  %v2520_v48 = vadd.f32 %v402_v30, %v392_v44 }
  0xa9   : > { %v417_v34 = vand.u32 2147483647, %v2504_v31  ;;  %v420_v35 = vand.u32 2139095040, %v2504_v31  ;;  %v521_v37 = vand.u32 2147483647, %v2506_v32  ;;  %v524_v38 = vand.u32 2139095040, %v2506_v32 }
  0xaa   : > { %v628_v43 = vand.u32 2139095040, %v2508_v33  ;;  %v625_v53 = vand.u32 2147483647, %v2508_v33  ;;  %v732_v63 = vand.u32 2139095040, %v2520_v48  ;;  %vm419_vm12 = vcmp.lt.s32.totalorder %v2504_v31, 0 }
  0xab   : > { %v421_v39 = vshrl.u32 %v420_v35, 23  ;;  %v424_v40 = vand.u32 8388607, %v417_v34  ;;  %v525_v41 = vshrl.u32 %v524_v38, 23  ;;  %v528_v42 = vand.u32 8388607, %v521_v37 }
  0xac   : > { %v629_v47 = vshrl.u32 %v628_v43, 23  ;;  %v2529_v61 = vand.u32 8388607, %v625_v53  ;;  %vm2607_vm13 = vcmp.le.f32.partialorder %v417_v34, 0.7853982  ;;  %vm523_vm15 = vcmp.lt.s32.totalorder %v2506_v32, 0 }
  0xad   : > { %v2031_v45 = vadd.s32 4294967169, %v421_v39  ;;  %v2035_v46 = vadd.s32 4294967169, %v525_v41  ;;  %v425_v49 = vor.u32 8388608, %v424_v40  ;;  %v529_v51 = vor.u32 8388608, %v528_v42 }
  0xae   : > { %v2039_v54 = vadd.s32 4294967169, %v629_v47 }
  0xaf   : > { %v427_v50 = vadd.s32 1, %v2031_v45  ;;  %v531_v52 = vadd.s32 1, %v2035_v46  ;;  %v2523_v58 = vshll.u32 %v425_v49, 8  ;;  %v2525_v60 = vshll.u32 %v529_v51, 8 }
  0xb0   : > { %v2531_v62 = vadd.s32 1, %v2039_v54 }
  0xb1   : > { %vm428_vm0 = vcmp.gt.s32.totalorder %v427_v50, 0  ;;  %vm532_vm1 = vcmp.gt.s32.totalorder %v531_v52, 0 }
  0xb2   : > { %v429_v55 = vsel %vm428_vm0, %v427_v50, 0  ;;  %v533_v59 = vsel %vm532_vm1, %v531_v52, 0  ;;  %vm636_vm6 = vcmp.gt.s32.totalorder %v2531_v62, 0 }
  0xb3   : > { %v430_v56 = vshrl.u32 %v429_v55, 5  ;;  %v431_v57 = vand.u32 31, %v429_v55  ;;  %v2535_v3 = vshrl.u32 %v533_v59, 5  ;;  %v535_v4 = vand.u32 31, %v533_v59 }
  0xb5   : > { %v432_v0 = vsub.s32 32, %v431_v57  ;;  %v434_v2 = vshll.u32 %v2343_v1, %v431_v57  ;;  %v437_v6 = vshll.u32 %v2344_v5, %v431_v57  ;;  %v440_v8 = vshll.u32 %v2345_v7, %v431_v57 }
  0xb6   : > { %v443_v10 = vshll.u32 %v2346_v9, %v431_v57  ;;  %v446_v12 = vshll.u32 %v2347_v11, %v431_v57  ;;  %vm449_vm2 = vcmp.lt.s32.totalorder %v430_v56, 1  ;;  %vm450_vm3 = vcmp.lt.s32.totalorder %v430_v56, 2 }
  0xb7   : > { %v435_v13 = vshrl.u32 %v2344_v5, %v432_v0  ;;  %v438_v14 = vshrl.u32 %v2345_v7, %v432_v0  ;;  %v441_v15 = vshrl.u32 %v2346_v9, %v432_v0  ;;  %v433_v16 = vshrl.u32 %v2343_v1, %v432_v0 }
  0xb8   : > { %v444_v17 = vshrl.u32 %v2347_v11, %v432_v0  ;;  %v447_v19 = vshrl.u32 %v2348_v18, %v432_v0  ;;  %v536_v23 = vsub.s32 32, %v535_v4  ;;  %vm451_vm4 = vcmp.lt.s32.totalorder %v430_v56, 3 }
  0xb9   : > { %v436_v20 = vor.u32 %v435_v13, %v434_v2  ;;  %v439_v21 = vor.u32 %v438_v14, %v437_v6  ;;  %v442_v22 = vor.u32 %v441_v15, %v440_v8  ;;  %vm452_vm5 = vcmp.lt.s32.totalorder %v430_v56, 4 }
  0xba   : > { %v445_v24 = vor.u32 %v444_v17, %v443_v10  ;;  %v448_v25 = vor.u32 %v447_v19, %v446_v12  ;;  %v538_v38 = vshll.u32 %v2343_v1, %v535_v4  ;;  %v539_v41 = vshrl.u32 %v2344_v5, %v536_v23 }
  0xbb   : > { %v453_v26 = vsel %vm449_vm2, %v433_v16, %v436_v20  ;;  %v454_v27 = vsel %vm452_vm5, %v442_v22, 2102212464  ;;  %v457_v28 = vsel %vm449_vm2, %v436_v20, %v439_v21  ;;  %v461_v29 = vsel %vm449_vm2, %v439_v21, %v442_v22 }
  0xbc   : > { %v455_v30 = vsel %vm451_vm4, %v439_v21, %v454_v27  ;;  %v458_v35 = vsel %vm452_vm5, %v445_v24, 920167782  ;;  %v462_v36 = vsel %vm452_vm5, %v448_v25, 1326507024  ;;  %v541_v42 = vshll.u32 %v2344_v5, %v535_v4 }
  0xbd   : > { %v459_v39 = vsel %vm451_vm4, %v442_v22, %v458_v35  ;;  %v463_v40 = vsel %vm451_vm4, %v445_v24, %v462_v36  ;;  %v456_v43 = vsel %vm450_vm3, %v453_v26, %v455_v30  ;;  %v542_v46 = vshrl.u32 %v2345_v7, %v536_v23 }
  0xbe   : > { %v460_v44 = vsel %vm450_vm3, %v457_v28, %v459_v39  ;;  %v464_v45 = vsel %vm450_vm3, %v461_v29, %v463_v40  ;;  %v540_v52 = vor.u32 %v539_v41, %v538_v38  ;;  %v544_v55 = vshll.u32 %v2345_v7, %v535_v4 }
  0xbf   : > { %v2559_v47 = vmul.u32.u64.low %v2523_v58, %v464_v45  ;;  %v2560_v49 = vmul.u32.u64.high %v2523_v58, %v464_v45, %v2559_v47  ;;  %v2563_v50 = vmul.u32.u64.low %v2523_v58, %v460_v44  ;;  %v2564_v51 = vmul.u32.u64.high %v2523_v58, %v460_v44, %v2563_v50 }
  0xc0   : > { %v543_v54 = vor.u32 %v542_v46, %v541_v42  ;;  %v545_v57 = vshrl.u32 %v2346_v9, %v536_v23  ;;  %v537_v59 = vshrl.u32 %v2343_v1, %v536_v23  ;;  %v547_v56 = vshll.u32 %v2346_v9, %v535_v4 }
  0xc1   : > { %v548_v0 = vshrl.u32 %v2347_v11, %v536_v23  ;;  %v551_v2 = vshrl.u32 %v2348_v18, %v536_v23  ;;  %v472_v6 = vmul.u32 %v2523_v58, %v456_v43  ;;  %v550_v10 = vshll.u32 %v2347_v11, %v535_v4 }
  0xc2   : > { %v546_v8 = vor.u32 %v545_v57, %v544_v55  ;;  %vm553_vm7 = vcmp.lt.s32.totalorder %v2535_v3, 1  ;;  %vm474_vm8 = vc.u32 %v2560_v49, %v2563_v50  ;;  %v475_v12 = vadd.s32 1, %v2564_v51 }
  0xc3   : > { %v549_v13 = vor.u32 %v548_v0, %v547_v56  ;;  %vm554_vm9 = vcmp.lt.s32.totalorder %v2535_v3, 2  ;;  %v552_v14 = vor.u32 %v551_v2, %v550_v10  ;;  %vm555_vm10 = vcmp.lt.s32.totalorder %v2535_v3, 3 }
  0xc4   : > { %vm556_vm11 = vcmp.lt.s32.totalorder %v2535_v3, 4  ;;  %v561_v15 = vsel %vm553_vm7, %v540_v52, %v543_v54  ;;  %v476_v58 = vsel %vm474_vm8, %v475_v12, %v2564_v51  ;;  %v565_v4 = vsel %vm553_vm7, %v543_v54, %v546_v8 }
  0xc5   : > { %v558_v16 = vsel %vm556_vm11, %v546_v8, 2102212464  ;;  %v562_v17 = vsel %vm556_vm11, %v549_v13, 920167782  ;;  %v477_v19 = vadd.s32 %v476_v58, %v472_v6  ;;  %v557_v20 = vsel %vm553_vm7, %v537_v59, %v540_v52 }
  0xc6   : > { %v563_v21 = vsel %vm555_vm10, %v546_v8, %v562_v17  ;;  %v566_v22 = vsel %vm556_vm11, %v552_v14, 1326507024  ;;  %v559_v23 = vsel %vm555_vm10, %v543_v54, %v558_v16  ;;  %v637_v26 = vsel %vm636_vm6, %v2531_v62, 0 }
  0xc7   : > { %v564_v24 = vsel %vm554_vm9, %v561_v15, %v563_v21  ;;  %v567_v25 = vsel %vm555_vm10, %v549_v13, %v566_v22  ;;  %v478_v27 = vadd.s32 536870912, %v477_v19  ;;  %v729_v38 = vand.u32 2147483647, %v2520_v48 }
  0xc8   : > { %v568_v28 = vsel %vm554_vm9, %v565_v4, %v567_v25  ;;  %v2589_v29 = vmul.u32.u64.low %v2525_v60, %v564_v24  ;;  %v2590_v30 = vmul.u32.u64.high %v2525_v60, %v564_v24, %v2589_v29  ;;  %v560_v40 = vsel %vm554_vm9, %v557_v20, %v559_v23 }
  0xc9   : > { %v2594_v35 = vmul.u32.u64.low %v2525_v60, %v568_v28  ;;  %v2595_v36 = vmul.u32.u64.high %v2525_v60, %v568_v28, %v2594_v35  ;;  %v479_v39 = vshrl.u32 %v478_v27, 30  ;;  %v633_v62 = vor.u32 8388608, %v2529_v61 }
  0xca   : > { %v639_v41 = vand.u32 31, %v637_v26  ;;  %v579_v43 = vadd.s32 1, %v2590_v30  ;;  %v733_v45 = vshrl.u32 %v732_v63, 23  ;;  %v576_v3 = vmul.u32 %v2525_v60, %v560_v40 }
  0xcb   : > { %v480_v42 = vshll.u32 %v479_v39, 30  ;;  %vm578_vm14 = vc.u32 %v2595_v36, %v2589_v29  ;;  %v2616_v61 = vand.u32 8388607, %v729_v38  ;;  %v503_v51 = vsub.s32 4, %v479_v39 }
  0xcc   : > { %v640_v44 = vsub.s32 32, %v639_v41  ;;  %v580_v63 = vsel %vm578_vm14, %v579_v43, %v2590_v30  ;;  %v2621_v52 = vshll.u32 %v633_v62, 8  ;;  %v473_v34 = vadd.s32 %v2563_v50, %v2560_v49 }
  0xcd   : > { %v2618_v47 = vsub.s32 %v477_v19, %v480_v42  ;;  %v581_v54 = vadd.s32 %v580_v63, %v576_v3  ;;  %v2624_v55 = vshrl.u32 %v637_v26, 5  ;;  %v2043_v0 = vadd.s32 4294967169, %v733_v45 }
  0xce   : > { %v643_v60 = vshrl.u32 %v2344_v5, %v640_v44  ;;  %v646_v59 = vshrl.u32 %v2345_v7, %v640_v44  ;;  %v649_v56 = vshrl.u32 %v2346_v9, %v640_v44  ;;  %v642_v6 = vshll.u32 %v2343_v1, %v639_v41 }
  0xcf   : > { %v483_v57 = vsub.s32 0, %v2618_v47  ;;  %v582_v2 = vadd.s32 536870912, %v581_v54  ;;  %v645_v8 = vshll.u32 %v2344_v5, %v639_v41  ;;  %v737_v10 = vor.u32 8388608, %v2616_v61 }
  0xd0   : > { %v504_v50 = vsel %vm419_vm12, %v503_v51, %v479_v39  ;;  %v648_v12 = vshll.u32 %v2345_v7, %v639_v41  ;;  %v652_v13 = vshrl.u32 %v2347_v11, %v640_v44  ;;  %v644_v15 = vor.u32 %v643_v60, %v642_v6 }
  0xd1   : > { %v2032_v49 = vmin.u32 %v483_v57, %v2618_v47  ;;  %v583_v14 = vshrl.u32 %v582_v2, 30  ;;  %v651_v58 = vshll.u32 %v2346_v9, %v639_v41  ;;  %v655_v16 = vshrl.u32 %v2348_v18, %v640_v44 }
  0xd2   : > { %v647_v4 = vor.u32 %v646_v59, %v645_v8  ;;  %v650_v19 = vor.u32 %v649_v56, %v648_v12  ;;  %v654_v20 = vshll.u32 %v2347_v11, %v639_v41  ;;  %v2644_v21 = vsel %vm2607_vm13, 0, %v504_v50 }
  0xd3   : > { %v485_v17 = vclz %v2032_v49  ;;  %v584_v22 = vshll.u32 %v583_v14, 30  ;;  %v653_v23 = vor.u32 %v652_v13, %v651_v58  ;;  %vm657_vm0 = vcmp.lt.s32.totalorder %v2624_v55, 1 }
  0xd4   : > { %v656_v25 = vor.u32 %v655_v16, %v654_v20  ;;  %vm658_vm1 = vcmp.lt.s32.totalorder %v2624_v55, 2  ;;  %vm660_vm2 = vcmp.lt.s32.totalorder %v2624_v55, 4  ;;  %v641_v27 = vshrl.u32 %v2343_v1, %v640_v44 }
  0xd5   : > { %v2033_v24 = vadd.s32 4294967294, %v485_v17  ;;  %v2649_v26 = vsub.s32 %v581_v54, %v584_v22  ;;  %vm659_vm3 = vcmp.lt.s32.totalorder %v2624_v55, 3  ;;  %v666_v28 = vsel %vm660_vm2, %v653_v23, 920167782 }
  0xd6   : > { %v510_v30 = vadd.s32 3, %v2644_v21  ;;  %vm2658_vm5 = vcmp.le.f32.partialorder %v521_v37, 0.7853982  ;;  %v665_v39 = vsel %vm657_vm0, %v644_v15, %v647_v4  ;;  %v667_v40 = vsel %vm659_vm3, %v650_v19, %v666_v28 }
  0xd7   : > { %vm2034_vm4 = vcmp.lt.s32.totalorder %v2033_v24, 0  ;;  %v587_v41 = vsub.s32 0, %v2649_v26  ;;  %v607_v42 = vsub.s32 4, %v583_v14  ;;  %v669_v43 = vsel %vm657_vm0, %v647_v4, %v650_v19 }
  0xd8   : > { %v488_v62 = vsel %vm2034_vm4, 0, %v2033_v24  ;;  %v662_v37 = vsel %vm660_vm2, %v650_v19, 2102212464  ;;  %v670_v3 = vsel %vm660_vm2, %v656_v25, 1326507024  ;;  %v668_v54 = vsel %vm658_vm1, %v665_v39, %v667_v40 }
  0xd9   : > { %v489_v44 = vsub.s32 32, %v488_v62  ;;  %v493_v45 = vsub.s32 4294967266, %v488_v62  ;;  %v490_v51 = vshll.u32 %v2618_v47, %v488_v62  ;;  %v2036_v63 = vmin.u32 %v587_v41, %v2649_v26 }
  0xda   : > { %v671_v60 = vsel %vm659_vm3, %v653_v23, %v670_v3  ;;  %v739_v2 = vadd.s32 1, %v2043_v0  ;;  %v608_v8 = vsel %vm523_vm15, %v607_v42, %v583_v14  ;;  %v661_v47 = vsel %vm657_vm0, %v641_v27, %v644_v15 }
  0xdb   : > { %v491_v57 = vshrl.u32 %v473_v34, %v489_v44  ;;  %v494_v59 = vadd.s32 127, %v493_v45  ;;  %v672_v56 = vsel %vm658_vm1, %v669_v43, %v671_v60  ;;  %v589_v6 = vclz %v2036_v63 }
  0xdc   : > { %v663_v49 = vsel %vm659_vm3, %v647_v4, %v662_v37  ;;  %v2688_v13 = vmul.u32.u64.low %v2621_v52, %v672_v56  ;;  %v2689_v34 = vmul.u32.u64.high %v2621_v52, %v672_v56, %v2688_v13  ;;  %vm740_vm6 = vcmp.gt.s32.totalorder %v739_v2, 0 }
  0xdd   : > { %v492_v50 = vor.u32 %v491_v57, %v490_v51  ;;  %v495_v12 = vshll.u32 %v494_v59, 23  ;;  %v2037_v58 = vadd.s32 4294967294, %v589_v6  ;;  %v577_v15 = vadd.s32 %v2589_v29, %v2595_v36 }
  0xde   : > { %v2692_v16 = vmul.u32.u64.low %v2621_v52, %v668_v54  ;;  %v2693_v0 = vmul.u32.u64.high %v2621_v52, %v668_v54, %v2692_v16  ;;  %v664_v17 = vsel %vm658_vm1, %v661_v47, %v663_v49  ;;  %v741_v4 = vsel %vm740_vm6, %v739_v2, 0 }
  0xdf   : > { %v496_v14 = vor.u32 4788187, %v495_v12  ;;  %v2700_v19 = vand.u32 3, %v510_v30  ;;  %vm2038_vm7 = vcmp.lt.s32.totalorder %v2037_v58, 0  ;;  %v2704_v20 = vsel %vm2658_vm5, 0, %v608_v8 }
  0xe0   : > { %v743_v22 = vand.u32 31, %v741_v4  ;;  %v499_v24 = vcvt.s32.f32 %v492_v50  ;;  %v592_v25 = vsel %vm2038_vm7, 0, %v2037_v58  ;;  %vm682_vm8 = vc.u32 %v2689_v34, %v2692_v16 }
  0xe1   : > { %v497_v23 = vand.u32 2147483647, %v496_v14  ;;  %v593_v27 = vsub.s32 32, %v592_v25  ;;  %v597_v29 = vsub.s32 4294967266, %v592_v25  ;;  %v680_v36 = vmul.u32 %v2621_v52, %v664_v17 }
  0xe2   : > { %v683_v55 = vadd.s32 1, %v2693_v0  ;;  %v594_v30 = vshll.u32 %v2649_v26, %v592_v25  ;;  %v2711_v39 = vshrl.u32 %v741_v4, 5  ;;  %v744_v40 = vsub.s32 32, %v743_v22 }
  0xe3   : > { %v500_v28 = vmul.f32 %v499_v24, %v497_v23  ;;  %v595_v62 = vshrl.u32 %v577_v15, %v593_v27  ;;  %v598_v41 = vadd.s32 127, %v597_v29  ;;  %v746_v43 = vshll.u32 %v2343_v1, %v743_v22 }
  0xe4   : > { %v684_v42 = vsel %vm682_vm8, %v683_v55, %v2693_v0  ;;  %v747_v37 = vshrl.u32 %v2344_v5, %v744_v40  ;;  %v749_v52 = vshll.u32 %v2344_v5, %v743_v22  ;;  %v750_v63 = vshrl.u32 %v2345_v7, %v744_v40 }
  0xe5   : > { %v501_v44 = vxor.u32 2147483648, %v500_v28  ;;  %v685_v45 = vadd.s32 %v684_v42, %v680_v36  ;;  %v596_v3 = vor.u32 %v595_v62, %v594_v30  ;;  %v599_v51 = vshll.u32 %v598_v41, 23 }
  0xe6   : > { %v753_v26 = vshrl.u32 %v2346_v9, %v744_v40  ;;  %v748_v57 = vor.u32 %v747_v37, %v746_v43  ;;  %v752_v59 = vshll.u32 %v2345_v7, %v743_v22  ;;  %v755_v5 = vshll.u32 %v2346_v9, %v743_v22 }
  0xe7   : > { %v502_v54 = vsel %vm419_vm12, %v501_v44, %v500_v28  ;;  %v686_v60 = vadd.s32 536870912, %v685_v45  ;;  %v600_v2 = vor.u32 4788187, %v599_v51  ;;  %v603_v6 = vcvt.s32.f32 %v596_v3 }
  0xe8   : > { %v505_v56 = vsel %vm2607_vm13, %v2504_v31, %v502_v54  ;;  %v751_v47 = vor.u32 %v750_v63, %v749_v52  ;;  %v756_v49 = vshrl.u32 %v2347_v11, %v744_v40  ;;  %v754_v12 = vor.u32 %v753_v26, %v752_v59 }
  0xe9   : > { %2198 = vcosq.f32 %v505_v56  ;;  %v2726_v8 = vshrl.u32 %v686_v60, 30  ;;  %v601_v50 = vand.u32 2147483647, %v600_v2  ;;  %v759_v13 = vshrl.u32 %v2348_v18, %v744_v40 }
  0xea   : > { %2200 = vsinq.f32 %v505_v56  ;;  %v757_v58 = vor.u32 %v756_v49, %v755_v5  ;;  %v614_v0 = vadd.s32 3, %v2704_v20  ;;  %v758_v14 = vshll.u32 %v2347_v11, %v743_v22 }
  0xeb   : > { %v688_v7 = vshll.u32 %v2726_v8, 30  ;;  %v604_v46 = vmul.f32 %v603_v6, %v601_v50  ;;  %v2735_v9 = vshll.u32 %v737_v10, 8  ;;  %v745_v17 = vshrl.u32 %v2343_v1, %v744_v40 }
  0xec   : > { %vm761_vm9 = vcmp.lt.s32.totalorder %v2711_v39, 1  ;;  %vm764_vm10 = vcmp.lt.s32.totalorder %v2711_v39, 4  ;;  %vm513_vm11 = vcmp.eq.s32.totalorder %v2700_v19, 0  ;;  %v760_v4 = vor.u32 %v759_v13, %v758_v14 }
  0xed   : > { %v2737_v15 = vsub.s32 %v685_v45, %v688_v7  ;;  %v605_v18 = vxor.u32 2147483648, %v604_v46  ;;  %v766_v23 = vsel %vm764_vm10, %v754_v12, 2102212464  ;;  %v769_v11 = vsel %vm761_vm9, %v748_v57, %v751_v47 }
  0xee   : > { %vm512_vm12 = vcmp.lt.s32.totalorder %v2700_v19, 2  ;;  %vm762_vm13 = vcmp.lt.s32.totalorder %v2711_v39, 2  ;;  %vm763_vm14 = vcmp.lt.s32.totalorder %v2711_v39, 3  ;;  %v770_v1 = vsel %vm764_vm10, %v757_v58, 920167782 }
  0xef   : > { %v691_v61 = vsub.s32 0, %v2737_v15  ;;  %vm509_vm0 = vweird.f32 %v2504_v31  ;;  %v606_v10 = vsel %vm523_vm15, %v605_v18, %v604_v46  ;;  %v765_v22 = vsel %vm761_vm9, %v745_v17, %v748_v57 }
  0xf0   : > { %v767_v24 = vsel %vm763_vm14, %v751_v47, %v766_v23  ;;  %v771_v25 = vsel %vm763_vm14, %v754_v12, %v770_v1  ;;  %v609_v27 = vsel %vm2658_vm5, %v2506_v32, %v606_v10  ;;  %v773_v55 = vsel %vm761_vm9, %v751_v47, %v754_v12  ;;  %v387_v1 = vpop.permute.xlu1 %386 }
  0xf1   : > { %v2040_v29 = vmin.u32 %v691_v61, %v2737_v15  ;;  %v772_v36 = vsel %vm762_vm13, %v769_v11, %v771_v25  ;;  %2202 = vcosq.f32 %v609_v27  ;;  %v774_v28 = vsel %vm764_vm10, %v760_v4, 1326507024 }
  0xf2   : > { %v2773_v30 = vmul.u32.u64.low %v2735_v9, %v772_v36  ;;  %v2774_v40 = vmul.u32.u64.high %v2735_v9, %v772_v36, %v2773_v30  ;;  %vm516_vm15 = vcmp.eq.s32.totalorder %v2700_v19, 2  ;;  %2204 = vsinq.f32 %v609_v27  ;;  %v373_v27 = vld [vmem:[%s2499_s29 + $0x20] sm:$0x3] }
  0xf3   : > { %v2199_v62 = vpop.eup %2198  ;;  %v693_v35 = vclz %v2040_v29  ;;  %v768_v41 = vsel %vm762_vm13, %v765_v22, %v767_v24  ;;  %v615_v44 = vand.u32 3, %v614_v0  ;;  %v681_v45 = vadd.s32 %v2692_v16, %v2689_v34  ;;  %v374_v29 = vld [vmem:[%s2499_s29 + $0x28] sm:$0x3] }
  0xf4   : > { %v2201_v42 = vpop.eup %2200  ;;  %v517_v43 = vxor.u32 2147483648, %v2199_v62  ;;  %v775_v37 = vsel %vm763_vm14, %v757_v58, %v774_v28  ;;  %v930_v63 = vand.u32 3, %v2644_v21  ;;  %v784_v57 = vmul.u32 %v2735_v9, %v768_v41 }
  0xf5   : > { %v514_v52 = vxor.u32 2147483648, %v2201_v42  ;;  %v2041_v3 = vadd.s32 4294967294, %v693_v35  ;;  %v776_v51 = vsel %vm762_vm13, %v773_v55, %v775_v37  ;;  %v787_v16 = vadd.s32 1, %v2774_v40 }
  0xf6   : > { %v518_v26 = vsel %vm516_vm15, %v517_v43, %v2201_v42  ;;  %v2788_v54 = vmul.u32.u64.low %v2735_v9, %v776_v51  ;;  %v2789_v60 = vmul.u32.u64.high %v2735_v9, %v776_v51, %v2788_v54  ;;  %vm932_vm2 = vcmp.eq.s32.totalorder %v930_v63, 0  ;;  %v407_v51 = vpop.permute.xlu1 %406 }
  0xf7   : > { %v515_v34 = vsel %vm513_vm11, %v2199_v62, %v514_v52  ;;  %vm2042_vm1 = vcmp.lt.s32.totalorder %v2041_v3, 0  ;;  %vm931_vm3 = vcmp.lt.s32.totalorder %v930_v63, 2  ;;  %v934_v21 = vsel %vm932_vm2, %v2199_v62, %v514_v52  ;;  %v375_v62 = vld [vmem:[%s2499_s29 + $0x30] sm:$0x3] }
  0xf8   : > { %v519_v39 = vsel %vm512_vm12, %v515_v34, %v518_v26  ;;  %v696_v59 = vsel %vm2042_vm1, 0, %v2041_v3  ;;  %vm935_vm4 = vcmp.eq.s32.totalorder %v930_v63, 2  ;;  %vm786_vm5 = vc.u32 %v2789_v60, %v2773_v30 }
  0xf9   : > { %v2799_v56 = vsel %vm509_vm0, nan, %v519_v39  ;;  %v697_v2 = vsub.s32 32, %v696_v59  ;;  %v701_v6 = vsub.s32 4294967266, %v696_v59  ;;  %v698_v5 = vshll.u32 %v2737_v15, %v696_v59 }
  0xfa   : > { %v937_v47 = vsel %vm935_vm4, %v517_v43, %v2201_v42  ;;  %v1033_v49 = vand.u32 3, %v2704_v20  ;;  %v788_v12 = vsel %vm786_vm5, %v787_v16, %v2774_v40  ;;  %vm613_vm6 = vweird.f32 %v2506_v32  ;;  %v376_v42 = vld [vmem:[%s2499_s29 + $0x38] sm:$0x3] }
  0xfb   : > { %v699_v19 = vshrl.u32 %v681_v45, %v697_v2  ;;  %v702_v50 = vadd.s32 127, %v701_v6  ;;  %v938_v13 = vsel %vm931_vm3, %v934_v21, %v937_v47  ;;  %v2203_v7 = vpop.eup %2202  ;;  %vm616_vm7 = vcmp.lt.s32.totalorder %v615_v44, 2 }
  0xfc   : > { %v789_v58 = vadd.s32 %v788_v12, %v784_v57  ;;  %v2809_v46 = vsel %vm509_vm0, nan, %v938_v13  ;;  %v2205_v0 = vpop.eup %2204  ;;  %vm617_vm8 = vcmp.eq.s32.totalorder %v615_v44, 0  ;;  %v621_v14 = vxor.u32 2147483648, %v2203_v7 }
  0xfd   : > { %v700_v9 = vor.u32 %v699_v19, %v698_v5  ;;  %v703_v15 = vshll.u32 %v702_v50, 23  ;;  %v618_v20 = vxor.u32 2147483648, %v2205_v0  ;;  %vm620_vm9 = vcmp.eq.s32.totalorder %v615_v44, 2 }
  0xfe   : > { %v790_v17 = vadd.s32 536870912, %v789_v58  ;;  %vm1038_vm10 = vcmp.eq.s32.totalorder %v1033_v49, 2  ;;  %v622_v18 = vsel %vm620_vm9, %v621_v14, %v2205_v0  ;;  %vm1035_vm11 = vcmp.eq.s32.totalorder %v1033_v49, 0 }
  0xff   : > { %v704_v4 = vor.u32 4788187, %v703_v15  ;;  %v1040_v23 = vsel %vm1038_vm10, %v621_v14, %v2205_v0  ;;  %v619_v11 = vsel %vm617_vm8, %v2203_v7, %v618_v20  ;;  %vm1034_vm12 = vcmp.lt.s32.totalorder %v1033_v49, 2 }
 0x100   : > { %v2811_v31 = vshrl.u32 %v790_v17, 30  ;;  %v1037_v61 = vsel %vm1035_vm11, %v2203_v7, %v618_v20  ;;  %v623_v10 = vsel %vm616_vm7, %v619_v11, %v622_v18  ;;  %v707_v24 = vcvt.s32.f32 %v700_v9  ;;  %v2849_v17 = vld [vmem:[%s2972_s3 + $0x8] sm:$0xff] }
 0x101   : > { %v705_v22 = vand.u32 2147483647, %v704_v4  ;;  %v1041_v25 = vsel %vm1034_vm12, %v1037_v61, %v1040_v23  ;;  %v624_v36 = vsel %vm613_vm6, nan, %v623_v10  ;;  %v711_v55 = vsub.s32 4, %v2726_v8 }
 0x102   : > { %v792_v28 = vshll.u32 %v2811_v31, 30  ;;  %v1042_v40 = vsel %vm613_vm6, nan, %v1041_v25  ;;  %v393_v43 = vmul.f32 %v387_v1, %v373_v27  ;;  %v394_v44 = vmul.f32 %v387_v1, %v374_v29  ;;  %v1259_v27 = vld [vmem:[%s2972_s3 + $0x10] sm:$0xff] }
 0x103   : > { %v708_v35 = vmul.f32 %v707_v24, %v705_v22  ;;  %vm627_vm13 = vcmp.lt.s32.totalorder %v2508_v33, 0  ;;  %v395_v37 = vmul.f32 %v387_v1, %v375_v62  ;;  %vm626_vm14 = vcmp.le.f32.partialorder %v625_v53, 0.7853982  ;;  %v1260_v62 = vld [vmem:[%s2972_s3 + $0x18] sm:$0xff] }
 0x104   : > { %v793_v41 = vsub.s32 %v789_v58, %v792_v28  ;;  %v712_v52 = vsel %vm627_vm13, %v711_v55, %v2726_v8  ;;  %v396_v32 = vmul.f32 %v387_v1, %v376_v42  ;;  %v413_v26 = vadd.f32 %v407_v51, %v393_v43 }
 0x105   : > { %v709_v45 = vxor.u32 2147483648, %v708_v35  ;;  %v414_v54 = vadd.f32 %v407_v51, %v394_v44  ;;  %v415_v16 = vadd.f32 %v407_v51, %v395_v37  ;;  %v714_v39 = vsel %vm626_vm14, 0, %v712_v52 }
 0x106   : > { %v795_v3 = vsub.s32 0, %v793_v41  ;;  %1253 = vst [vmem:[#allocation2 + $0x40] sm:$0x3] %v413_v26  ;;  %v416_v21 = vadd.f32 %v407_v51, %v396_v32  ;;  %v2092_v53 = vpack.c.bf16 %v1042_v40, %v624_v36  ;;  %v2094_v8 = vpack.c.bf16 %v2809_v46, %v2799_v56  ;;  %v2838_v56 = vld [vmem:[%s2972_s3] sm:$0xff] }
 0x107   : > { %v710_v63 = vsel %vm627_vm13, %v709_v45, %v708_v35  ;;  %1254 = vst [vmem:[#allocation2 + $0x48] sm:$0x3] %v414_v54  ;;  %1255 = vst [vmem:[#allocation2 + $0x50] sm:$0x3] %v415_v16  ;;  %v718_v6 = vadd.s32 3, %v714_v39  ;;  %v2349_v5 = vmov 0.0   ;;  %v785_v49 = vadd.s32 %v2773_v30, %v2789_v60 }
 0x108   : > { %v713_v57 = vsel %vm626_vm14, %v2508_v33, %v710_v63  ;;  %v2044_v34 = vmin.u32 %v795_v3, %v793_v41  ;;  %1256 = vst [vmem:[#allocation2 + $0x58] sm:$0x3] %v416_v21  ;;  %2093 = vmatprep.subr.bf16.mxu0 %v2092_v53  ;;  %1387 = vmatprep.mubr.f32.mxu0 %v2349_v5  ;;  %vm1310_vm15 = vcmask 1041408   ;;  %vm1297_vm1 = vcmask 146432  }
 0x109   : > { %2206 = vcosq.f32 %v713_v57  ;;  %2095 = vmatpush1.bf16.msra.mxu0 %v2094_v8  ;;  %1476 = vmatprep.mubr.f32.mxu1 %v2349_v5  ;;  %v719_v13 = vand.u32 3, %v718_v6  ;;  %v1136_v7 = vand.u32 3, %v714_v39  ;;  %vm717_vm2 = vweird.f32 %v2508_v33 }
 0x10a   : > { %2208 = vsinq.f32 %v713_v57  ;;  %v797_v59 = vclz %v2044_v34  ;;  %v815_v28 = vsub.s32 4, %v2811_v31  ;;  %vm731_vm9 = vcmp.lt.s32.totalorder %v2520_v48, 0 }
 0x10b   : > { %vm721_vm3 = vcmp.eq.s32.totalorder %v719_v13, 0  ;;  %vm724_vm4 = vcmp.eq.s32.totalorder %v719_v13, 2  ;;  %vm1141_vm5 = vcmp.eq.s32.totalorder %v1136_v7, 2  ;;  %vm1138_vm6 = vcmp.eq.s32.totalorder %v1136_v7, 0 }
 0x10c   : > { %v2045_v2 = vadd.s32 4294967294, %v797_v59  ;;  %vm720_vm7 = vcmp.lt.s32.totalorder %v719_v13, 2  ;;  %vm1137_vm8 = vcmp.lt.s32.totalorder %v1136_v7, 2  ;;  %vm730_vm10 = vcmp.le.f32.partialorder %v729_v38, 0.7853982 }
 0x10d   : > { %v1269_v58 = vld [vmem:[#allocation2 + $0x40] sm:$0x3]  ;;  %v816_v33 = vsel %vm731_vm9, %v815_v28, %v2811_v31 }
 0x10e   : > { %vm2046_vm0 = vcmp.lt.s32.totalorder %v2045_v2, 0  ;;  %v1270_v12 = vld [vmem:[#allocation2 + $0x48] sm:$0x3]  ;;  %v818_v42 = vsel %vm730_vm10, 0, %v816_v33  ;;  %v1271_v21 = vld [vmem:[#allocation2 + $0x50] sm:$0x3] }
 0x10f   : > { %v800_v47 = vsel %vm2046_vm0, 0, %v2045_v2  ;;  %2063 = vmatprep.subr.msk.mxu0 %vm1310_vm15, %v1270_v12  ;;  %v822_v43 = vadd.s32 3, %v818_v42  ;;  %v1239_v45 = vand.u32 3, %v818_v42  ;;  %v1272_v59 = vld [vmem:[#allocation2 + $0x58] sm:$0x3] }
 0x110   : > { %v801_v19 = vsub.s32 32, %v800_v47  ;;  %v805_v50 = vsub.s32 4294967266, %v800_v47  ;;  %v802_v46 = vshll.u32 %v793_v41, %v800_v47  ;;  %2064 = vmatpush1.msk.msra.mxu0 %vm1310_vm15, %v1269_v58  ;;  %v1285_v47 = vpop.permute.xlu1 %1284 }
 0x111   : > { %2065 = vmatmul.mubr.msk.f32.vlgmr.msra.gmra.mrb[0].mxu0 %vm1297_vm1, %v2838_v56  ;;  %v823_v44 = vand.u32 3, %v822_v43  ;;  %vm1244_vm12 = vcmp.eq.s32.totalorder %v1239_v45, 2  ;;  %vm1241_vm14 = vcmp.eq.s32.totalorder %v1239_v45, 0 }
 0x112   : > { %v803_v0 = vshrl.u32 %v785_v49, %v801_v19  ;;  %v806_v14 = vadd.s32 127, %v805_v50  ;;  %1393 = vmatprep.mubr.f32.mxu0 %v2349_v5 }
 0x113   : > { %v2207_v30 = vpop.eup %2206  ;;  %vm828_vm11 = vcmp.eq.s32.totalorder %v823_v44, 2  ;;  %vm825_vm13 = vcmp.eq.s32.totalorder %v823_v44, 0  ;;  %vm824_vm0 = vcmp.lt.s32.totalorder %v823_v44, 2 }
 0x114   : > { %v2209_v60 = vpop.eup %2208  ;;  %v725_v9 = vxor.u32 2147483648, %v2207_v30  ;;  %v804_v15 = vor.u32 %v803_v0, %v802_v46  ;;  %v807_v20 = vshll.u32 %v806_v14, 23  ;;  %v1295_v0 = vpop.permute.xlu1 %1294 }
 0x115   : > { %v722_v18 = vxor.u32 2147483648, %v2209_v60  ;;  %2066 = vmatmul.mubr.msk.f32.gmra.mrb[2].mxu0 %vm1297_vm1, %v2849_v17 }
 0x116   : > { %v726_v4 = vsel %vm724_vm4, %v725_v9, %v2209_v60  ;;  %v808_v23 = vor.u32 4788187, %v807_v20  ;;  %v1143_v11 = vsel %vm1141_vm5, %v725_v9, %v2209_v60  ;;  %v811_v24 = vcvt.s32.f32 %v804_v15  ;;  %1399 = vmatprep.mubr.f32.mxu0 %v2349_v5 }
 0x117   : > { %v723_v61 = vsel %vm721_vm3, %v2207_v30, %v722_v18  ;;  %v1140_v1 = vsel %vm1138_vm6, %v2207_v30, %v722_v18  ;;  %vm821_vm3 = vweird.f32 %v2520_v48 }
 0x118   : > { %v727_v10 = vsel %vm720_vm7, %v723_v61, %v726_v4  ;;  %v809_v22 = vand.u32 2147483647, %v808_v23  ;;  %v1144_v25 = vsel %vm1137_vm8, %v1140_v1, %v1143_v11 }
 0x119   : > { %v728_v29 = vsel %vm717_vm2, nan, %v727_v10  ;;  %v1145_v36 = vsel %vm717_vm2, nan, %v1144_v25  ;;  %2067 = vmatmul.mubr.msk.f32.gmra.mrb[4].mxu0 %vm1297_vm1, %v1259_v27  ;;  %vm1240_vm2 = vcmp.lt.s32.totalorder %v1239_v45, 2  ;;  %v1517_v25 = vld [vmem:[%s2974_s5] sm:$0xff] }
 0x11a   : > { %v812_v55 = vmul.f32 %v811_v24, %v809_v22  ;;  %1405 = vmatprep.mubr.f32.mxu0 %v2349_v5  ;;  %v2098_v16 = vpack.c.bf16 %v1145_v36, %v728_v29  ;;  %v1519_v36 = vld [vmem:[%s2974_s5 + $0x10] sm:$0xff] }
 0x11c   : > { %v813_v40 = vxor.u32 2147483648, %v812_v55 }
 0x11d   : > { %2068 = vmatmul.mubr.msk.f32.gmra.mrb[6].mxu0 %vm1297_vm1, %v1260_v62 }
 0x11e   : > { %v814_v35 = vsel %vm731_vm9, %v813_v40, %v812_v55  ;;  %1622 = vmatprep.mubr.f32.mxu0 %v2349_v5 }
 0x11f   : > { %v817_v41 = vsel %vm730_vm10, %v2520_v48, %v814_v35  ;;  %v1280_v48 = vpop.permute.xlu0 %1279  ;;  %v1520_v35 = vld [vmem:[%s2974_s5 + $0x18] sm:$0xff] }
 0x120   : > { %2210 = vcosq.f32 %v817_v41 }
 0x121   : > { %2212 = vsinq.f32 %v817_v41 }
 0x12a   : > { %v2211_v37 = vpop.eup %2210 }
 0x12b   : > { %v2213_v52 = vpop.eup %2212  ;;  %v829_v3 = vxor.u32 2147483648, %v2211_v37 }
 0x12c   : > { %v826_v51 = vxor.u32 2147483648, %v2213_v52 }
 0x12d   : > { %v830_v38 = vsel %vm828_vm11, %v829_v3, %v2213_v52  ;;  %v1246_v31 = vsel %vm1244_vm12, %v829_v3, %v2213_v52 }
 0x12e   : > { %v827_v63 = vsel %vm825_vm13, %v2211_v37, %v826_v51  ;;  %v1243_v32 = vsel %vm1241_vm14, %v2211_v37, %v826_v51 }
 0x12f   : > { %v831_v26 = vsel %vm824_vm0, %v827_v63, %v830_v38  ;;  %v1247_v54 = vsel %vm1240_vm2, %v1243_v32, %v1246_v31 }
 0x130   : > { %v832_v57 = vsel %vm821_vm3, nan, %v831_v26  ;;  %v1248_v34 = vsel %vm821_vm3, nan, %v1247_v54 }
 0x131   : > { %v2096_v39 = vpack.c.bf16 %v1248_v34, %v832_v57 }
 0x133   : > { %2097 = vmatprep.subr.bf16.mxu1 %v2096_v39 }
 0x134   : > { %2099 = vmatpush1.bf16.msra.mxu1 %v2098_v16 }
 0x135   : > { %2069 = vmatprep.subr.msk.mxu1 %vm1310_vm15, %v1272_v59 }
 0x138   : > { %2070 = vmatpush1.msk.msra.mxu1 %vm1310_vm15, %v1271_v21  ;;  %vm1545_vm15 = vcmask 261120  }
 0x139   : > { %2071 = vmatmul.mubr.msk.f32.vlgmr.msra.gmra.mrb[0].mxu1 %vm1297_vm1, %v2838_v56  ;;  %v1290_v56 = vpop.permute.xlu0 %1289 }
 0x13a   : > { %1482 = vmatprep.mubr.f32.mxu1 %v2349_v5 }
 0x13d   : > { %2072 = vmatmul.mubr.msk.f32.gmra.mrb[2].mxu1 %vm1297_vm1, %v2849_v17 }
 0x13e   : > { %1488 = vmatprep.mubr.f32.mxu1 %v2349_v5 }
 0x141   : > { %2073 = vmatmul.mubr.msk.f32.gmra.mrb[4].mxu1 %vm1297_vm1, %v1259_v27  ;;  %v1518_v27 = vld [vmem:[%s2974_s5 + $0x8] sm:$0xff] }
 0x142   : > { %1494 = vmatprep.mubr.f32.mxu1 %v2349_v5 }
 0x145   : > { %2074 = vmatmul.mubr.msk.f32.gmra.mrb[6].mxu1 %vm1297_vm1, %v1260_v62 }
 0x146   : > { %1711 = vmatprep.mubr.f32.mxu1 %v2349_v5 }
 0x1e4   : > { %v1389_v53 = vpop.f32.mrb[0].mxu0 }
 0x1e5   : > { %v1390_v8 = vadd.f32 %v1389_v53, %v1280_v48  ;;  %v1391_v2 = vpop.f32.mrb[1].mxu0  ;;  %v1528_v53 = vpop.permute.xlu0 %1527 }
 0x1e6   : > { %v1392_v6 = vadd.f32 %v1391_v2, %v1280_v48 }
 0x1e7   : > { %2214 = vtanh.f32 %v1390_v8 }
 0x1e8   : > { %v1395_v49 = vpop.f32.mrb[2].mxu0  ;;  %2216 = vtanh.f32 %v1392_v6 }
 0x1e9   : > { %v1396_v19 = vadd.f32 %v1395_v49, %v1285_v47  ;;  %v1397_v50 = vpop.f32.mrb[3].mxu0  ;;  %v1533_v49 = vpop.permute.xlu1 %1532 }
 0x1ea   : > { %v1398_v12 = vadd.f32 %v1397_v50, %v1285_v47 }
 0x1eb   : > { %2218 = vtanh.f32 %v1396_v19 }
 0x1ec   : > { %2220 = vtanh.f32 %v1398_v12  ;;  %v1401_v13 = vpop.f32.mrb[4].mxu0 }
 0x1ed   : > { %v1402_v7 = vadd.f32 %v1401_v13, %v1290_v56  ;;  %v1403_v58 = vpop.f32.mrb[5].mxu0  ;;  %v1538_v13 = vpop.permute.xlu0 %1537 }
 0x1ee   : > { %v1404_v46 = vadd.f32 %v1403_v58, %v1290_v56 }
 0x1ef   : > { %2222 = vtanh.f32 %v1402_v7 }
 0x1f0   : > { %v1407_v14 = vpop.f32.mrb[6].mxu0  ;;  %2224 = vtanh.f32 %v1404_v46 }
 0x1f1   : > { %v1408_v30 = vadd.f32 %v1407_v14, %v1295_v0  ;;  %v1409_v60 = vpop.f32.mrb[7].mxu0  ;;  %v2215_v15 = vpop.eup %2214 }
 0x1f2   : > { %v1410_v9 = vadd.f32 %v1409_v60, %v1295_v0  ;;  %v2217_v20 = vpop.eup %2216 }
 0x1f3   : > { %2226 = vtanh.f32 %v1408_v30 }
 0x1f4   : > { %2228 = vtanh.f32 %v1410_v9 }
 0x1f5   : > { %v2219_v17 = vpop.eup %2218 }
 0x1f6   : > { %v2221_v18 = vpop.eup %2220  ;;  %v2102_v4 = vpack.c.bf16 %v2219_v17, %v2215_v15 }
 0x1f7   : > { %v2100_v23 = vpack.c.bf16 %v2221_v18, %v2217_v20 }
 0x1f9   : > { %2101 = vmatprep.subr.bf16.mxu0 %v2100_v23  ;;  %v2223_v11 = vpop.eup %2222 }
 0x1fa   : > { %2103 = vmatpush1.bf16.msra.mxu0 %v2102_v4  ;;  %v2225_v61 = vpop.eup %2224 }
 0x1fd   : > { %v2227_v1 = vpop.eup %2226 }
 0x1fe   : > { %v2229_v10 = vpop.eup %2228  ;;  %v2106_v22 = vpack.c.bf16 %v2227_v1, %v2223_v11 }
 0x1ff   : > { %v2104_v24 = vpack.c.bf16 %v2229_v10, %v2225_v61 }
 0x201   : > { %2105 = vmatprep.subr.bf16.mxu0 %v2104_v24 }
 0x202   : > { %2107 = vmatpush1.bf16.msra.mxu0 %v2106_v22 }
 0x205   : > { %2075 = vmatmul.mubr.msk.f32.vlgmr.msra.gmra.mrb[8].mxu0 %vm1545_vm15, %v1517_v25 }
 0x206   : > { %1628 = vmatprep.mubr.f32.mxu0 %v2349_v5 }
 0x209   : > { %2076 = vmatmul.mubr.msk.f32.gmra.mrb[10].mxu0 %vm1545_vm15, %v1518_v27 }
 0x20a   : > { %1634 = vmatprep.mubr.f32.mxu0 %v2349_v5 }
 0x20c   : > { %v1478_v29 = vpop.f32.mrb[0].mxu1 }
 0x20d   : > { %v1479_v55 = vadd.f32 %v1478_v29, %v1280_v48  ;;  %v1480_v28 = vpop.f32.mrb[1].mxu1  ;;  %2077 = vmatmul.mubr.msk.f32.gmra.mrb[12].mxu0 %vm1545_vm15, %v1519_v36 }
 0x20e   : > { %v1481_v40 = vadd.f32 %v1480_v28, %v1280_v48  ;;  %1640 = vmatprep.mubr.f32.mxu0 %v2349_v5 }
 0x20f   : > { %2230 = vtanh.f32 %v1479_v55 }
 0x210   : > { %v1484_v62 = vpop.f32.mrb[2].mxu1  ;;  %2232 = vtanh.f32 %v1481_v40 }
 0x211   : > { %v1485_v33 = vadd.f32 %v1484_v62, %v1285_v47  ;;  %v1486_v41 = vpop.f32.mrb[3].mxu1  ;;  %2078 = vmatmul.mubr.msk.f32.gmra.mrb[14].mxu0 %vm1545_vm15, %v1520_v35 }
 0x212   : > { %v1487_v42 = vadd.f32 %v1486_v41, %v1285_v47  ;;  %1830 = vmatprep.mubr.f32.mxu0 %v2349_v5 }
 0x213   : > { %2234 = vtanh.f32 %v1485_v33 }
 0x214   : > { %2236 = vtanh.f32 %v1487_v42  ;;  %v1490_v43 = vpop.f32.mrb[4].mxu1 }
 0x215   : > { %v1491_v44 = vadd.f32 %v1490_v43, %v1290_v56  ;;  %v1492_v45 = vpop.f32.mrb[5].mxu1 }
 0x216   : > { %v1493_v37 = vadd.f32 %v1492_v45, %v1290_v56 }
 0x217   : > { %2238 = vtanh.f32 %v1491_v44 }
 0x218   : > { %v1496_v52 = vpop.f32.mrb[6].mxu1  ;;  %2240 = vtanh.f32 %v1493_v37 }
 0x219   : > { %v1497_v3 = vadd.f32 %v1496_v52, %v1295_v0  ;;  %v1498_v51 = vpop.f32.mrb[7].mxu1  ;;  %v2231_v31 = vpop.eup %2230 }
 0x21a   : > { %v1499_v38 = vadd.f32 %v1498_v51, %v1295_v0  ;;  %v2233_v63 = vpop.eup %2232 }
 0x21b   : > { %2242 = vtanh.f32 %v1497_v3 }
 0x21c   : > { %2244 = vtanh.f32 %v1499_v38 }
 0x21d   : > { %v2235_v32 = vpop.eup %2234 }
 0x21e   : > { %v2237_v26 = vpop.eup %2236  ;;  %v2110_v54 = vpack.c.bf16 %v2235_v32, %v2231_v31 }
 0x21f   : > { %v2108_v57 = vpack.c.bf16 %v2237_v26, %v2233_v63 }
 0x221   : > { %2109 = vmatprep.subr.bf16.mxu1 %v2108_v57  ;;  %v2239_v34 = vpop.eup %2238 }
 0x222   : > { %2111 = vmatpush1.bf16.msra.mxu1 %v2110_v54  ;;  %v2241_v16 = vpop.eup %2240 }
 0x225   : > { %v2243_v39 = vpop.eup %2242 }
 0x226   : > { %v2245_v59 = vpop.eup %2244  ;;  %v2114_v21 = vpack.c.bf16 %v2243_v39, %v2239_v34 }
 0x227   : > { %v2112_v48 = vpack.c.bf16 %v2245_v59, %v2241_v16  ;;  %v1759_v59 = vlaneseq }
 0x229   : > { %2113 = vmatprep.subr.bf16.mxu1 %v2112_v48  ;;  %vm1939_vm1 = vcmp.lt.s32.totalorder %v1759_v59, 512 }
 0x22a   : > { %2115 = vmatpush1.bf16.msra.mxu1 %v2114_v21  ;;  %v1760_v21 = vshrl.u32 %v1759_v59, 7 }
 0x22c   : > { %v1761_v48 = vsub.s32 0, %v1760_v21 }
 0x22d   : > { %2079 = vmatmul.mubr.msk.f32.vlgmr.msra.gmra.mrb[8].mxu1 %vm1545_vm15, %v1517_v25  ;;  %v1752_v25 = vld [vmem:[%s2976_s7] sm:$0x1] }
 0x22e   : > { %1717 = vmatprep.mubr.f32.mxu1 %v2349_v5 }
 0x231   : > { %2080 = vmatmul.mubr.msk.f32.gmra.mrb[10].mxu1 %vm1545_vm15, %v1518_v27 }
 0x232   : > { %1723 = vmatprep.mubr.f32.mxu1 %v2349_v5 }
 0x235   : > { %2081 = vmatmul.mubr.msk.f32.gmra.mrb[12].mxu1 %vm1545_vm15, %v1519_v36 }
 0x236   : > { %1729 = vmatprep.mubr.f32.mxu1 %v2349_v5 }
 0x239   : > { %2082 = vmatmul.mubr.msk.f32.gmra.mrb[14].mxu1 %vm1545_vm15, %v1520_v35 }
 0x23a   : > { %1901 = vmatprep.mubr.f32.mxu1 %v2349_v5  ;;  %v1543_v5 = vpop.permute.xlu1 %1542 }
 0x2d8   : > { %v1624_v8 = vpop.f32.mrb[8].mxu0 }
 0x2d9   : > { %v1625_v2 = vadd.f32 %v1624_v8, %v1528_v53  ;;  %v1626_v6 = vpop.f32.mrb[9].mxu0 }
 0x2da   : > { %v1627_v47 = vadd.f32 %v1626_v6, %v1528_v53 }
 0x2db   : > { %2246 = vtanh.f32 %v1625_v2 }
 0x2dc   : > { %v1630_v19 = vpop.f32.mrb[10].mxu0  ;;  %2248 = vtanh.f32 %v1627_v47 }
 0x2dd   : > { %v1631_v50 = vadd.f32 %v1630_v19, %v1533_v49  ;;  %v1632_v12 = vpop.f32.mrb[11].mxu0 }
 0x2de   : > { %v1633_v56 = vadd.f32 %v1632_v12, %v1533_v49 }
 0x2df   : > { %2250 = vtanh.f32 %v1631_v50  ;;  %v2350_v50 = vmov 1966171168  }
 0x2e0   : > { %2252 = vtanh.f32 %v1633_v56  ;;  %v1636_v7 = vpop.f32.mrb[12].mxu0  ;;  %v1915_v12 = vunpack.c.l.s4 %v2350_v50 }
 0x2e1   : > { %v1637_v58 = vadd.f32 %v1636_v7, %v1538_v13  ;;  %v1638_v46 = vpop.f32.mrb[13].mxu0 }
 0x2e2   : > { %v1639_v0 = vadd.f32 %v1638_v46, %v1538_v13  ;;  %v1916_v56 = vunpack.c.0.s8 %v1915_v12 }
 0x2e3   : > { %2254 = vtanh.f32 %v1637_v58 }
 0x2e4   : > { %v1642_v14 = vpop.f32.mrb[14].mxu0  ;;  %2256 = vtanh.f32 %v1639_v0 }
 0x2e5   : > { %v1643_v30 = vadd.f32 %v1642_v14, %v1543_v5  ;;  %v1644_v60 = vpop.f32.mrb[15].mxu0  ;;  %v2247_v15 = vpop.eup %2246 }
 0x2e6   : > { %v1645_v9 = vadd.f32 %v1644_v60, %v1543_v5  ;;  %v2249_v20 = vpop.eup %2248 }
 0x2e7   : > { %2258 = vtanh.f32 %v1643_v30 }
 0x2e8   : > { %2260 = vtanh.f32 %v1645_v9 }
 0x2e9   : > { %v2251_v17 = vpop.eup %2250 }
 0x2ea   : > { %v2253_v18 = vpop.eup %2252  ;;  %v2118_v4 = vpack.c.bf16 %v2251_v17, %v2247_v15 }
 0x2eb   : > { %v2116_v23 = vpack.c.bf16 %v2253_v18, %v2249_v20 }
 0x2ed   : > { %2117 = vmatprep.subr.bf16.mxu0 %v2116_v23  ;;  %v2255_v11 = vpop.eup %2254 }
 0x2ee   : > { %2119 = vmatpush1.bf16.msra.mxu0 %v2118_v4  ;;  %v2257_v61 = vpop.eup %2256 }
 0x2f1   : > { %v2259_v1 = vpop.eup %2258 }
 0x2f2   : > { %v2261_v10 = vpop.eup %2260  ;;  %v2122_v22 = vpack.c.bf16 %v2259_v1, %v2255_v11 }
 0x2f3   : > { %v2120_v24 = vpack.c.bf16 %v2261_v10, %v2257_v61 }
 0x2f5   : > { %2121 = vmatprep.subr.bf16.mxu0 %v2120_v24 }
 0x2f6   : > { %2123 = vmatpush1.bf16.msra.mxu0 %v2122_v22 }
 0x2f9   : > { %2083 = vmatmul.mubr.msk.f32.vlgmr.msra.gmra.mrb[16].mxu0 %vm1545_vm15, %v1752_v25 }
 0x300   : > { %v1713_v27 = vpop.f32.mrb[8].mxu1 }
 0x301   : > { %v1714_v29 = vadd.f32 %v1713_v27, %v1528_v53  ;;  %v1715_v36 = vpop.f32.mrb[9].mxu1 }
 0x302   : > { %v1716_v55 = vadd.f32 %v1715_v36, %v1528_v53  ;;  %v1757_v53 = vpop.permute.xlu0 %1756 }
 0x303   : > { %2262 = vtanh.f32 %v1714_v29  ;;  %v1762_v8 = vrot.slane %v1757_v53, %v1761_v48 }
 0x304   : > { %v1719_v28 = vpop.f32.mrb[10].mxu1  ;;  %2264 = vtanh.f32 %v1716_v55 }
 0x305   : > { %v1720_v40 = vadd.f32 %v1719_v28, %v1533_v49  ;;  %v1721_v62 = vpop.f32.mrb[11].mxu1 }
 0x306   : > { %v1722_v35 = vadd.f32 %v1721_v62, %v1533_v49 }
 0x307   : > { %2266 = vtanh.f32 %v1720_v40 }
 0x308   : > { %2268 = vtanh.f32 %v1722_v35  ;;  %v1725_v33 = vpop.f32.mrb[12].mxu1 }
 0x309   : > { %v1726_v41 = vadd.f32 %v1725_v33, %v1538_v13  ;;  %v1727_v42 = vpop.f32.mrb[13].mxu1 }
 0x30a   : > { %v1728_v43 = vadd.f32 %v1727_v42, %v1538_v13  ;;  %v1919_v13 = vsub.s32 %v1916_v56, %v1760_v21 }
 0x30b   : > { %2270 = vtanh.f32 %v1726_v41 }
 0x30c   : > { %v1731_v44 = vpop.f32.mrb[14].mxu1  ;;  %2272 = vtanh.f32 %v1728_v43 }
 0x30d   : > { %v1732_v45 = vadd.f32 %v1731_v44, %v1543_v5  ;;  %v1733_v37 = vpop.f32.mrb[15].mxu1  ;;  %v2263_v3 = vpop.eup %2262 }
 0x30e   : > { %v1734_v52 = vadd.f32 %v1733_v37, %v1543_v5  ;;  %v2265_v51 = vpop.eup %2264 }
 0x30f   : > { %2274 = vtanh.f32 %v1732_v45 }
 0x310   : > { %2276 = vtanh.f32 %v1734_v52 }
 0x311   : > { %v2267_v38 = vpop.eup %2266 }
 0x312   : > { %v2269_v31 = vpop.eup %2268  ;;  %v2126_v63 = vpack.c.bf16 %v2267_v38, %v2263_v3 }
 0x313   : > { %v2124_v32 = vpack.c.bf16 %v2269_v31, %v2265_v51 }
 0x315   : > { %2125 = vmatprep.subr.bf16.mxu1 %v2124_v32  ;;  %v2271_v26 = vpop.eup %2270 }
 0x316   : > { %2127 = vmatpush1.bf16.msra.mxu1 %v2126_v63  ;;  %v2273_v54 = vpop.eup %2272 }
 0x319   : > { %v2275_v57 = vpop.eup %2274 }
 0x31a   : > { %v2277_v34 = vpop.eup %2276  ;;  %v2130_v16 = vpack.c.bf16 %v2275_v57, %v2271_v26 }
 0x31b   : > { %v2128_v39 = vpack.c.bf16 %v2277_v34, %v2273_v54 }
 0x31d   : > { %2129 = vmatprep.subr.bf16.mxu1 %v2128_v39 }
 0x31e   : > { %2131 = vmatpush1.bf16.msra.mxu1 %v2130_v16 }
 0x321   : > { %2084 = vmatmul.mubr.msk.f32.vlgmr.msra.gmra.mrb[16].mxu1 %vm1545_vm15, %v1752_v25 }
 0x3cc   : > { %v1832_v2 = vpop.f32.mrb[16].mxu0 }
 0x3cd   : > { %v1833_v6 = vadd.f32 %v1832_v2, %v1762_v8  ;;  %v1834_v47 = vpop.f32.mrb[17].mxu0 }
 0x3ce   : > { %v1835_v49 = vadd.f32 %v1834_v47, %v1762_v8 }
 0x3d0   : > { %v1912_v19 = vcombine.low %v1833_v6, %v1835_v49 }
 0x3d2   : > { %v1920_v5 = vrot.slane %v1912_v19, %v1919_v13 }
 0x3f4   : > { %v1903_v7 = vpop.f32.mrb[16].mxu1 }
 0x3f5   : > { %v1904_v58 = vadd.f32 %v1903_v7, %v1762_v8  ;;  %v1905_v46 = vpop.f32.mrb[17].mxu1 }
 0x3f6   : > { %v1906_v0 = vadd.f32 %v1905_v46, %v1762_v8 }
 0x3f8   : > { %v1913_v14 = vcombine.low %v1904_v58, %v1906_v0 }
 0x3fa   : > { %v1927_v30 = vrot.slane %v1913_v14, %v1919_v13 }
 0x3fc   : > { %v1928_v60 = vcombine.low %v1920_v5, %v1927_v30 }
 0x3fe   : > { %v1935_v9 = vrot.slane %v1928_v60, %v1919_v13 }
 0x400   : > { %1941 = vst.msk [vmem:[%s366_s25] sm:$0xf] %vm1939_vm1, %v1935_v9 }
 0x401   : > { %2291 = shalt.err (!%p2288_p5)
}
 0x402   : > { %s2292_s27 = scalar_lea.hbm %s2926_s30, 64  ;;  %s2296_s24 = scalar_lea.hbm %s2978_s9, 256 }
 0x403   : > { %p2293_p7 = scmp.ne.s32.totalorder %s2926_s30, %s2292_s27  ;;  %p2297_p11 = scmp.lt.u32.totalorder %s2926_s30, %s2978_s9 }
 0x404   : > { %p2298_p12 = scmp.lt.u32.totalorder %s2296_s24, %s2292_s27  ;;  %p2300_p0 = scmp.lt.u32.totalorder %s2292_s27, %s2926_s30 }
 0x405   : > { %p2294_p9 = pnand %p2293_p7, %p2443_p6 }
 0x406   : > { %p2299_p13 = por %p2298_p12, %p2297_p11 }
 0x407   : > { %p2295_p10 = pneg %p2294_p9 }
 0x408   : > { %p2301_p1 = por %p2300_p0, %p2299_p13 }
 0x40a   : > { %p2302_p2 = pnand %p2301_p1, %p2295_p10 }
 0x40c   : > { %2305 = shalt.err (!%p2302_p2)
}
 0x40d   : > { %2148 = dma.vmem_to_hbm [thread:$0]  (%p2443_p6), %s2928_s26, 64, %s2926_s30, %s1943_s10  }
 0x40e PF: > { %p2154_p3 = scmp.ge.s32.totalorder %s2340_s14, 2  ;;  %s1969_s29 = sand.u32 1, %s2328_s11  }
 0x40f   : > { %s1970_s15 = scalar_lea.sflag [#allocation6], %s1969_s29 }
 0x410   : > { %p2151_p4 = pnand %p2154_p3, %p2447_p8 }
 0x412   : > { %2323 = dma.done.wait (!%p2151_p4), %s1970_s15, 64  }
 0x413   : > { %2325 = vsyncadd (!%p2151_p4), %s1970_s15, 4294967232  ;;  %p21_p5 = scmp.ge.s32.totalorder %s2428_s16, 6   ;;  %s2985_s11 = smov %s2332_s12 }
 0x414   : > { %s2986_s12 = smov %s2336_s13  ;;  %s2987_s13 = smov %s2441_s19 }
 0x415   : > { %s2988_s14 = smov %s2428_s16  ;;  %23 = sbr.rel (!%p21_p5) target bundleno = 6 (0x6), region = 119 }
 0x41c   :  { %1975 = vsyncpa [#allocation6], 1 }
 0x41d   :  { %1977 = vsyncpa [#allocation6 + $0x1], 1 }

</bundles_post_ra>
